<compile_context>
chip_gen: v7x
topology: tpu7x:2x2x1
jax: 0.10.0
libtpu: 0.0.40
codegen_flags: <defaults>
</compile_context>

<pallas_src>
import functools

import jax
import jax.numpy as jnp
from jax import lax
from jax.experimental import pallas as pl
from jax.experimental.pallas import tpu as pltpu


KPAD = 128  # lane-dense padding of the class dimension for the HBM output


def _pick_tile(n, pref=256):
    """Largest tile from a preferred list that divides n (fallback: full)."""
    for t in (pref, 256, 128, 64, 32, 16):
        if t <= n and n % t == 0:
            return t
    return n


# ----------------------------------------------------------------------------
# Pallas kernels
# ----------------------------------------------------------------------------
def _sage_layer_kernel(a_ref, hsrc_ref, hdst_ref, wself_ref, wneigh_ref, b_ref,
                       o_ref, acc_ref, *, apply_relu):
    """One SAGEConv ('mean') layer, tiled over (dst rows, src reduction)."""
    k = pl.program_id(1)

    @pl.when(k == 0)
    def _init():
        acc_ref[...] = jnp.zeros_like(acc_ref)

    # neigh accumulation: bf16 x bf16 -> f32 on the MXU
    acc_ref[...] += jnp.dot(a_ref[...], hsrc_ref[...],
                            preferred_element_type=jnp.float32)

    @pl.when(k == pl.num_programs(1) - 1)
    def _finalize():
        neigh = acc_ref[...].astype(jnp.bfloat16)
        out = (jnp.dot(hdst_ref[...], wself_ref[...],
                       preferred_element_type=jnp.float32)
               + jnp.dot(neigh, wneigh_ref[...],
                         preferred_element_type=jnp.float32)
               + b_ref[...])
        if apply_relu:
            out = jnp.maximum(out, 0.0)           # f32 on the VPU
        o_ref[...] = out.astype(o_ref.dtype)


def _sage_last_layer_head_kernel(a_ref, hsrc_ref, hdst_ref, wself_ref,
                                 wneigh_ref, b_ref, wp_top_ref, wp_bot_ref,
                                 wpp_top_ref, wpp_bot_ref, o_ref, acc_ref,
                                 *, center_num, kpad):
    """Last SAGEConv layer with the prompt head fused into its epilogue."""
    k = pl.program_id(1)

    @pl.when(k == 0)
    def _init():
        acc_ref[...] = jnp.zeros_like(acc_ref)

    acc_ref[...] += jnp.dot(a_ref[...], hsrc_ref[...],
                            preferred_element_type=jnp.float32)

    @pl.when(k == pl.num_programs(1) - 1)
    def _finalize():
        neigh = acc_ref[...].astype(jnp.bfloat16)
        h = (jnp.dot(hdst_ref[...], wself_ref[...],
                     preferred_element_type=jnp.float32)
             + jnp.dot(neigh, wneigh_ref[...],
                       preferred_element_type=jnp.float32)
             + b_ref[...])

        # final activations; relu on bf16 is exact, so no f32 round-trip needed
        h_act = jnp.maximum(h, 0.0).astype(jnp.bfloat16)
        hd_act = jnp.maximum(hdst_ref[...], 0).astype(jnp.bfloat16)

        # prompt logits via split weights (no lane-axis concat)
        logits = (jnp.dot(h_act, wp_top_ref[...],
                          preferred_element_type=jnp.float32)
                  + jnp.dot(hd_act, wp_bot_ref[...],
                            preferred_element_type=jnp.float32))
        maxv = jnp.max(logits, axis=1, keepdims=True)
        iota = lax.broadcasted_iota(jnp.int32, logits.shape, 1)
        masked = jnp.where(logits >= maxv, iota, jnp.int32(logits.shape[1]))
        idx = jnp.min(masked, axis=1, keepdims=True)     # first-max index

        # all per-center classifiers in ONE MXU matmul: [TM, C*KPAD]
        big = (jnp.dot(h_act, wpp_top_ref[...],
                       preferred_element_type=jnp.float32)
               + jnp.dot(hd_act, wpp_bot_ref[...],
                         preferred_element_type=jnp.float32))

        # argmax-routed select chain (kpad-aligned slices -> no VMEM copies)
        out = big[:, (center_num - 1) * kpad: center_num * kpad]
        for c in range(center_num - 2, -1, -1):          # tiny static unroll
            out = jnp.where(idx == c, big[:, c * kpad:(c + 1) * kpad], out)
        o_ref[...] = out.astype(o_ref.dtype)


# ----------------------------------------------------------------------------
# Wrappers
# ----------------------------------------------------------------------------
_CPARAMS = pltpu.CompilerParams(
    dimension_semantics=("parallel", "arbitrary"),
    vmem_limit_bytes=32 * 1024 * 1024,
)


def sage_layer(a_bf, h_bf, w_self, w_neigh, b, *, apply_relu, out_dtype,
               tm=256, tk=256):
    n_dst, n_src = a_bf.shape
    f_in = h_bf.shape[1]
    f_out = w_self.shape[1]
    tm = _pick_tile(n_dst, tm)
    tk = _pick_tile(n_src, tk)
    grid = (n_dst // tm, n_src // tk)

    flops = 2 * n_dst * n_src * f_in + 4 * n_dst * f_in * f_out
    bytes_accessed = (n_dst * n_src * 2 + grid[0] * n_src * f_in * 2
                      + n_dst * f_in * 2
                      + n_dst * f_out * jnp.dtype(out_dtype).itemsize)

    kernel = functools.partial(_sage_layer_kernel, apply_relu=apply_relu)
    return pl.pallas_call(
        kernel,
        out_shape=jax.ShapeDtypeStruct((n_dst, f_out), out_dtype),
        grid=grid,
        in_specs=[
            pl.BlockSpec((tm, tk), lambda i, k: (i, k)),       # A_norm
            pl.BlockSpec((tk, f_in), lambda i, k: (k, 0)),     # h_src
            pl.BlockSpec((tm, f_in), lambda i, k: (i, 0)),     # h_dst
            pl.BlockSpec((f_in, f_out), lambda i, k: (0, 0)),  # W_self
            pl.BlockSpec((f_in, f_out), lambda i, k: (0, 0)),  # W_neigh
            pl.BlockSpec((1, f_out), lambda i, k: (0, 0)),     # bias
        ],
        out_specs=pl.BlockSpec((tm, f_out), lambda i, k: (i, 0)),
        scratch_shapes=[pltpu.VMEM((tm, f_in), jnp.float32)],
        compiler_params=_CPARAMS,
        cost_estimate=pl.CostEstimate(flops=flops, transcendentals=0,
                                      bytes_accessed=int(bytes_accessed)),
    )(a_bf, h_bf, h_bf, w_self, w_neigh, b)


def sage_last_layer_with_head(a_bf, h_bf, w_self, w_neigh, b,
                              wp_top, wp_bot, wpp_top, wpp_bot,
                              *, center_num, kpad, tm=256, tk=256):
    n_dst, n_src = a_bf.shape
    f_in = h_bf.shape[1]
    f_out = w_self.shape[1]
    c_total = wpp_top.shape[1]          # center_num * kpad
    tm = _pick_tile(n_dst, tm)
    tk = _pick_tile(n_src, tk)
    grid = (n_dst // tm, n_src // tk)

    flops = (2 * n_dst * n_src * f_in + 4 * n_dst * f_in * f_out
             + 4 * n_dst * f_out * (center_num + c_total))
    bytes_accessed = (n_dst * n_src * 2 + grid[0] * n_src * f_in * 2
                      + n_dst * f_in * 2 + n_dst * kpad * 4)

    kernel = functools.partial(_sage_last_layer_head_kernel,
                               center_num=center_num, kpad=kpad)
    return pl.pallas_call(
        kernel,
        out_shape=jax.ShapeDtypeStruct((n_dst, kpad), jnp.float32),
        grid=grid,
        in_specs=[
            pl.BlockSpec((tm, tk), lambda i, k: (i, k)),                  # A
            pl.BlockSpec((tk, f_in), lambda i, k: (k, 0)),                # h_src
            pl.BlockSpec((tm, f_in), lambda i, k: (i, 0)),                # h_dst
            pl.BlockSpec((f_in, f_out), lambda i, k: (0, 0)),             # W_self
            pl.BlockSpec((f_in, f_out), lambda i, k: (0, 0)),             # W_neigh
            pl.BlockSpec((1, f_out), lambda i, k: (0, 0)),                # bias
            pl.BlockSpec((f_out, center_num), lambda i, k: (0, 0)),       # Wp top
            pl.BlockSpec((f_in, center_num), lambda i, k: (0, 0)),        # Wp bot
            pl.BlockSpec((f_out, c_total), lambda i, k: (0, 0)),          # Wpp top
            pl.BlockSpec((f_in, c_total), lambda i, k: (0, 0)),           # Wpp bot
        ],
        out_specs=pl.BlockSpec((tm, kpad), lambda i, k: (i, 0)),
        scratch_shapes=[pltpu.VMEM((tm, f_in), jnp.float32)],
        compiler_params=_CPARAMS,
        cost_estimate=pl.CostEstimate(flops=flops, transcendentals=0,
                                      bytes_accessed=int(bytes_accessed)),
    )(a_bf, h_bf, h_bf, w_self, w_neigh, b,
      wp_top, wp_bot, wpp_top, wpp_bot)


def graphsage_forward(x, a_norm, params):
    """Full forward pass of GraphSAGE (eval mode)."""
    a_bf = a_norm.astype(jnp.bfloat16)
    h = x.astype(jnp.bfloat16)

    layers = params["layers"]
    center_num = params["center_num"]
    n_classes = params["n_classes"]

    # all but the last layer: plain tiled SAGE layer (relu fused, bf16 out)
    for (w_self, w_neigh, b) in layers[:-1]:
        h = sage_layer(a_bf, h,
                       w_self.astype(jnp.bfloat16),
                       w_neigh.astype(jnp.bfloat16),
                       b, apply_relu=True, out_dtype=jnp.bfloat16)

    # last layer + fused prompt head
    w_self, w_neigh, b = layers[-1]
    h_dim = w_self.shape[1]                          # last-layer output dim
    wp = params["w_prompt_t"]                        # [2H, C]
    wp_top = wp[:h_dim].astype(jnp.bfloat16)
    wp_bot = wp[h_dim:].astype(jnp.bfloat16)

    wpp = params["w_pp_t"]                           # [C, 2H, K]
    wpp_pad = jnp.pad(wpp, ((0, 0), (0, 0), (0, KPAD - n_classes)))
    wpp_flat = jnp.transpose(wpp_pad, (1, 0, 2)).reshape(wpp.shape[1],
                                                         center_num * KPAD)
    wpp_top = wpp_flat[:h_dim].astype(jnp.bfloat16)
    wpp_bot = wpp_flat[h_dim:].astype(jnp.bfloat16)

    out_pad = sage_last_layer_with_head(
        a_bf, h, w_self.astype(jnp.bfloat16), w_neigh.astype(jnp.bfloat16), b,
        wp_top, wp_bot, wpp_top, wpp_bot,
        center_num=center_num, kpad=KPAD)
    return out_pad[:, :n_classes]


# ----------------------------------------------------------------------------
# Pure-JAX reference (mirrors the kernel's bf16-in / f32-accumulate numerics)
# ----------------------------------------------------------------------------
def graphsage_reference(x, a_norm, params):
    a_bf = a_norm.astype(jnp.bfloat16)
    h = x.astype(jnp.bfloat16)
    layers = params["layers"]
    n_layers = len(layers)
    h_dst = h
    h_last = None
    for l, (w_self, w_neigh, b) in enumerate(layers):
        h_dst = h
        ws = w_self.astype(jnp.bfloat16)
        wn = w_neigh.astype(jnp.bfloat16)
        neigh = jnp.dot(a_bf, h,
                        preferred_element_type=jnp.float32).astype(jnp.bfloat16)
        out = (jnp.dot(h_dst, ws, preferred_element_type=jnp.float32)
               + jnp.dot(neigh, wn, preferred_element_type=jnp.float32) + b)
        if l != n_layers - 1:
            h = jnp.maximum(out, 0.0).astype(jnp.bfloat16)
        else:
            h_last = out

    h_act = jnp.maximum(h_last, 0.0).astype(jnp.bfloat16)
    hd_act = jnp.maximum(h_dst.astype(jnp.float32), 0.0).astype(jnp.bfloat16)
    h_dim = h_act.shape[1]

    wp = params["w_prompt_t"].astype(jnp.bfloat16)
    logits = (jnp.dot(h_act, wp[:h_dim], preferred_element_type=jnp.float32)
              + jnp.dot(hd_act, wp[h_dim:], preferred_element_type=jnp.float32))
    idx = jnp.argmax(logits, axis=1)

    wpp = params["w_pp_t"].astype(jnp.bfloat16)     # [C, 2H, K]
    outs = []
    for c in range(params["center_num"]):
        oc = (jnp.dot(h_act, wpp[c, :h_dim], preferred_element_type=jnp.float32)
              + jnp.dot(hd_act, wpp[c, h_dim:],
                        preferred_element_type=jnp.float32))
        outs.append(oc)
    outs = jnp.stack(outs, axis=0)                  # [C, N, K]
    onehot = (idx[None, :] ==
              jnp.arange(params["center_num"])[:, None]).astype(jnp.float32)
    return jnp.einsum("cn,cnk->nk", onehot, outs)


# ----------------------------------------------------------------------------
# Main
# ----------------------------------------------------------------------------
if __name__ == "__main__":
    N = 512           # graph nodes (num_dst == num_src == N per block)
    IN_FEATS = 16
    N_HIDDEN = 32
    N_CLASSES = 8
    N_LAYERS = 2
    CENTER_NUM = 4

    key = jax.random.PRNGKey(0)
    keys = jax.random.split(key, 12)

    # Node features
    x = jax.random.normal(keys[0], (N, IN_FEATS), dtype=jnp.float32)

    # Random graph -> row-normalized dense adjacency (DGL 'mean' aggregator)
    adj_bin = (jax.random.uniform(keys[1], (N, N)) < 0.05).astype(jnp.float32)
    adj_bin = adj_bin.at[jnp.arange(N), jnp.arange(N)].set(1.0)  # avoid deg 0
    deg = jnp.maximum(adj_bin.sum(axis=1, keepdims=True), 1.0)
    a_norm = adj_bin / deg

    def init_w(k, shape, scale=0.1):
        return scale * jax.random.normal(k, shape, dtype=jnp.float32)

    layer_dims = [(IN_FEATS, N_HIDDEN)] + [(N_HIDDEN, N_HIDDEN)] * (N_LAYERS - 1)
    layers = []
    kidx = 2
    for (fin, fout) in layer_dims:
        w_self = init_w(keys[kidx], (fin, fout)); kidx += 1
        w_neigh = init_w(keys[kidx], (fin, fout)); kidx += 1
        b = jnp.zeros((1, fout), dtype=jnp.float32)
        layers.append((w_self, w_neigh, b))

    # prompt: Linear(2*n_hidden -> center_num, bias=False) stored transposed
    w_prompt_t = init_w(keys[kidx], (2 * N_HIDDEN, CENTER_NUM)); kidx += 1
    # pp[i]: Linear(2*n_hidden -> n_classes, bias=False) stacked transposed
    w_pp_t = init_w(keys[kidx], (CENTER_NUM, 2 * N_HIDDEN, N_CLASSES)); kidx += 1

    params = {
        "layers": layers,
        "w_prompt_t": w_prompt_t,
        "w_pp_t": w_pp_t,
        "center_num": CENTER_NUM,
        "n_classes": N_CLASSES,
    }

    out = graphsage_forward(x, a_norm, params)
    out = jax.block_until_ready(out)

    ref = graphsage_reference(x, a_norm, params)
    assert out.shape == (N, N_CLASSES), out.shape
    assert jnp.allclose(out, ref, rtol=2e-3, atol=2e-3), "mismatch vs reference"

    print("KERNEL_OK")
</pallas_src>

<mosaic_0001>
module attributes {stable_mosaic.version = 11 : i64} {
  func.func @_sage_layer_kernel(%arg0: i32, %arg1: i32, %arg2: memref<256x256xbf16, #tpu.memory_space<vmem>>, %arg3: memref<256x16xbf16, #tpu.memory_space<vmem>>, %arg4: memref<256x16xbf16, #tpu.memory_space<vmem>>, %arg5: memref<16x32xbf16, #tpu.memory_space<vmem>>, %arg6: memref<16x32xbf16, #tpu.memory_space<vmem>>, %arg7: memref<1x32xf32, #tpu.memory_space<vmem>>, %arg8: memref<256x32xbf16, #tpu.memory_space<vmem>>, %arg9: memref<256x16xf32, #tpu.memory_space<vmem>>) attributes {dimension_semantics = [#tpu.dimension_semantics<parallel>, #tpu.dimension_semantics<arbitrary>], iteration_bounds = array<i64: 2, 2>, scalar_prefetch = 0 : i64, scratch_operands = 1 : i64, tpu.core_type = #tpu.core_type<tc>, window_params = [{transform_indices = @transform_0, window_bounds = array<i64: 256, 256>}, {transform_indices = @transform_1, window_bounds = array<i64: 256, 16>}, {transform_indices = @transform_2, window_bounds = array<i64: 256, 16>}, {pipeline_mode = #tpu.pipeline_mode<synchronous>, transform_indices = @transform_3, window_bounds = array<i64: 16, 32>}, {pipeline_mode = #tpu.pipeline_mode<synchronous>, transform_indices = @transform_4, window_bounds = array<i64: 16, 32>}, {pipeline_mode = #tpu.pipeline_mode<synchronous>, transform_indices = @transform_5, window_bounds = array<i64: 1, 32>}, {transform_indices = @transform_6, window_bounds = array<i64: 256, 32>}]} {
    %c0_i32 = arith.constant 0 : i32
    %0 = arith.cmpi eq, %arg1, %c0_i32 : i32
    %1 = arith.extui %0 : i1 to i32
    %c0_i32_0 = arith.constant 0 : i32
    %2 = arith.cmpi ne, %1, %c0_i32_0 : i32
    scf.if %2 {
      %cst_9 = arith.constant 0.000000e+00 : f32
      %12 = vector.broadcast %cst_9 : f32 to vector<256x16xf32>
      %c0_10 = arith.constant 0 : index
      %c0_11 = arith.constant 0 : index
      %13 = vector.load %arg9[%c0_10, %c0_11] : memref<256x16xf32, #tpu.memory_space<vmem>>, vector<256x16xf32>
      tpu.vector_store %arg9[%c0_10, %c0_11], %12 {strides = array<i32>} : memref<256x16xf32, #tpu.memory_space<vmem>>, vector<256x16xf32>,
    } else {
    }
    %c0 = arith.constant 0 : index
    %c0_1 = arith.constant 0 : index
    %3 = vector.load %arg9[%c0, %c0_1] : memref<256x16xf32, #tpu.memory_space<vmem>>, vector<256x16xf32>
    %c0_2 = arith.constant 0 : index
    %c0_3 = arith.constant 0 : index
    %4 = vector.load %arg2[%c0_2, %c0_3] : memref<256x256xbf16, #tpu.memory_space<vmem>>, vector<256x256xbf16>
    %c0_4 = arith.constant 0 : index
    %c0_5 = arith.constant 0 : index
    %5 = vector.load %arg3[%c0_4, %c0_5] : memref<256x16xbf16, #tpu.memory_space<vmem>>, vector<256x16xbf16>
    %cst = arith.constant dense<0.000000e+00> : vector<256x16xf32>
    %6 = tpu.matmul %4, %5, %cst {dimension_numbers = #tpu.dot_dimension_numbers<[1], [0], [0], [1], [0, 0, 1, 1], [], []>} : vector<256x256xbf16>, vector<256x16xbf16>, vector<256x16xf32> -> vector<256x16xf32>
    %7 = arith.addf %3, %6 : vector<256x16xf32>
    %c0_6 = arith.constant 0 : index
    %c0_7 = arith.constant 0 : index
    %8 = vector.load %arg9[%c0_6, %c0_7] : memref<256x16xf32, #tpu.memory_space<vmem>>, vector<256x16xf32>
    tpu.vector_store %arg9[%c0_6, %c0_7], %7 {strides = array<i32>} : memref<256x16xf32, #tpu.memory_space<vmem>>, vector<256x16xf32>,
    %c1_i32 = arith.constant 1 : i32
    %9 = arith.cmpi eq, %arg1, %c1_i32 : i32
    %10 = arith.extui %9 : i1 to i32
    %c0_i32_8 = arith.constant 0 : i32
    %11 = arith.cmpi ne, %10, %c0_i32_8 : i32
    scf.if %11 {
      %c0_9 = arith.constant 0 : index
      %c0_10 = arith.constant 0 : index
      %12 = vector.load %arg9[%c0_9, %c0_10] : memref<256x16xf32, #tpu.memory_space<vmem>>, vector<256x16xf32>
      %13 = arith.truncf %12 : vector<256x16xf32> to vector<256x16xbf16>
      %c0_11 = arith.constant 0 : index
      %c0_12 = arith.constant 0 : index
      %14 = vector.load %arg4[%c0_11, %c0_12] : memref<256x16xbf16, #tpu.memory_space<vmem>>, vector<256x16xbf16>
      %c0_13 = arith.constant 0 : index
      %c0_14 = arith.constant 0 : index
      %15 = vector.load %arg5[%c0_13, %c0_14] : memref<16x32xbf16, #tpu.memory_space<vmem>>, vector<16x32xbf16>
      %cst_15 = arith.constant dense<0.000000e+00> : vector<256x32xf32>
      %16 = tpu.matmul %14, %15, %cst_15 {dimension_numbers = #tpu.dot_dimension_numbers<[1], [0], [0], [1], [0, 0, 1, 1], [], []>} : vector<256x16xbf16>, vector<16x32xbf16>, vector<256x32xf32> -> vector<256x32xf32>
      %c0_16 = arith.constant 0 : index
      %c0_17 = arith.constant 0 : index
      %17 = vector.load %arg6[%c0_16, %c0_17] : memref<16x32xbf16, #tpu.memory_space<vmem>>, vector<16x32xbf16>
      %cst_18 = arith.constant dense<0.000000e+00> : vector<256x32xf32>
      %18 = tpu.matmul %13, %17, %cst_18 {dimension_numbers = #tpu.dot_dimension_numbers<[1], [0], [0], [1], [0, 0, 1, 1], [], []>} : vector<256x16xbf16>, vector<16x32xbf16>, vector<256x32xf32> -> vector<256x32xf32>
      %19 = arith.addf %16, %18 : vector<256x32xf32>
      %c0_19 = arith.constant 0 : index
      %c0_20 = arith.constant 0 : index
      %20 = vector.load %arg7[%c0_19, %c0_20] : memref<1x32xf32, #tpu.memory_space<vmem>>, vector<1x32xf32>
      %21 = vector.broadcast %20 : vector<1x32xf32> to vector<256x32xf32>
      %22 = arith.addf %19, %21 : vector<256x32xf32>
      %cst_21 = arith.constant 0.000000e+00 : f32
      %23 = vector.broadcast %cst_21 : f32 to vector<256x32xf32>
      %24 = arith.maximumf %22, %23 : vector<256x32xf32>
      %25 = arith.truncf %24 : vector<256x32xf32> to vector<256x32xbf16>
      %c0_22 = arith.constant 0 : index
      %c0_23 = arith.constant 0 : index
      %26 = vector.load %arg8[%c0_22, %c0_23] : memref<256x32xbf16, #tpu.memory_space<vmem>>, vector<256x32xbf16>
      tpu.vector_store %arg8[%c0_22, %c0_23], %25 {strides = array<i32>} : memref<256x32xbf16, #tpu.memory_space<vmem>>, vector<256x32xbf16>,
    } else {
    }
    return
  }
  func.func @transform_0(%arg0: i32, %arg1: i32) -> (i32, i32) {
    %c0_i32 = arith.constant 0 : i32
    return %arg0, %arg1 : i32, i32
  }
  func.func @transform_1(%arg0: i32, %arg1: i32) -> (i32, i32) {
    %c0_i32 = arith.constant 0 : i32
    %c0_i32_0 = arith.constant 0 : i32
    return %arg1, %c0_i32 : i32, i32
  }
  func.func @transform_2(%arg0: i32, %arg1: i32) -> (i32, i32) {
    %c0_i32 = arith.constant 0 : i32
    %c0_i32_0 = arith.constant 0 : i32
    return %arg0, %c0_i32 : i32, i32
  }
  func.func @transform_3(%arg0: i32, %arg1: i32) -> (i32, i32) {
    %c0_i32 = arith.constant 0 : i32
    %c0_i32_0 = arith.constant 0 : i32
    %c0_i32_1 = arith.constant 0 : i32
    return %c0_i32, %c0_i32_0 : i32, i32
  }
  func.func @transform_4(%arg0: i32, %arg1: i32) -> (i32, i32) {
    %c0_i32 = arith.constant 0 : i32
    %c0_i32_0 = arith.constant 0 : i32
    %c0_i32_1 = arith.constant 0 : i32
    return %c0_i32, %c0_i32_0 : i32, i32
  }
  func.func @transform_5(%arg0: i32, %arg1: i32) -> (i32, i32) {
    %c0_i32 = arith.constant 0 : i32
    %c0_i32_0 = arith.constant 0 : i32
    %c0_i32_1 = arith.constant 0 : i32
    return %c0_i32, %c0_i32_0 : i32, i32
  }
  func.func @transform_6(%arg0: i32, %arg1: i32) -> (i32, i32) {
    %c0_i32 = arith.constant 0 : i32
    %c0_i32_0 = arith.constant 0 : i32
    return %arg0, %c0_i32 : i32, i32
  }
}

</mosaic_0001>

<bundles_post_ra>
// kernel: tpu_custom_call.1
= control target key start
LH: loop header
LB: loop body
LE: loop exit
PB: predicated region body
PF: predicated region fallthrough
CT: control target
= control target key end

     0   :  { %s3062_s0 = inlined_call_operand.hbm [shape: bf16[512,512], index: 0, kind: input, shape index: {}]   ;;  %s3063_s1 = inlined_call_operand.vmem [shape: bf16[512,16], index: 1, kind: input, shape index: {}]   ;;  %s3064_s2 = inlined_call_operand.vmem [shape: bf16[512,16], index: 2, kind: input, shape index: {}]   ;;  %s3065_s3 = inlined_call_operand.vmem [shape: bf16[16,32], index: 3, kind: input, shape index: {}]   ;;  %s3066_s4 = inlined_call_operand.vmem [shape: bf16[16,32], index: 4, kind: input, shape index: {}]   ;;  %s3067_s5 = inlined_call_operand.vmem [shape: f32[1,32], index: 5, kind: input, shape index: {}]   ;;  %s3068_s6 = inlined_call_operand.vmem [shape: bf16[512,32], index: 6, kind: output, shape index: {}]  }
   0x1   :  { %3070 = sst [smem:[#allocation7_spill]] %s3065_s3 }
   0x2   :  { %3071 = sst [smem:[#allocation8_spill]] %s3067_s5 }
   0x3   :  { %11 = vsyncpa [#allocation4], 0 }
   0x4   :  { %13 = vsyncpa [#allocation4 + $0x1], 0  ;;  %s2630_s21 = smov 0   ;;  %s2632_s22 = smov 0  }
   0x5   :  { %s2634_s23 = smov 0   ;;  %s2636_s24 = smov 0  }
   0x6   :  { %s2638_s25 = smov 0   ;;  %s2640_s26 = smov 0  }
   0x7   :  { %s2642_s27 = smov 0   ;;  %s2644_s28 = smov 0  }
   0x8 LB: > { %s1888_s29 = sadd.s32 4294967295, %s2588_s28   ;;  %s28_s30 = sadd.s32 1, %s2580_s26  ;;  %s2588_s28 = sphi %s2644_s28, %s19_s28   ;;  %s2584_s27 = sphi %s2642_s27, %s3085_s27   ;;  %s2580_s26 = sphi %s2640_s26, %s3084_s26   ;;  %s2576_s25 = sphi %s2638_s25, %s3083_s25   ;;  %s2572_s24 = sphi %s2636_s24, %s3082_s24   ;;  %s2568_s23 = sphi %s2634_s23, %s3081_s23   ;;  %s2564_s22 = sphi %s2632_s22, %s3080_s22   ;;  %s2560_s21 = sphi %s2630_s21, %s3079_s21  }
   0x9   : > { %p29_p0 = scmp.ge.s32.totalorder %s28_s30, 2  ;;  %s31_s7 = sadd.s32 1, %s2584_s27 }
   0xa   : > { %s40_s8 = sadd.s32 1, %s2568_s23  ;;  %p47_p1 = scmp.ne.s32.totalorder %s2568_s23, %s2564_s22 }
   0xb   : > { %s3087_s30 = smov (%p29_p0, %s28_s30), 0  ;;  %s3089_s7 = smov (!%p29_p0, %s31_s7), %s2584_s27 }
   0xc   : > { %3072 = sst [smem:[#allocation6_spill]] %s3087_s30  ;;  %s36_s9 = ssub.s32 %s2580_s26, %s3087_s30 }
   0xd   : > { %p48_p2 = scmp.eq.s32.totalorder %s2588_s28, 0  ;;  %p33_p3 = scmp.ge.s32.totalorder %s3089_s7, 2 }
   0xe   : > { %p53_p4 = scmp.ne.s32.totalorder %s2564_s22, %s2560_s21  ;;  %p54_p6 = scmp.eq.s32.totalorder %s1888_s29, 0 }
   0xf   : > { %p2681_p5 = por %p48_p2, %p47_p1  ;;  %s3091_s7 = smov (%p33_p3, %s3089_s7), 0 }
  0x10   : > { %p2687_p7 = por %p54_p6, %p53_p4  ;;  %s35_s12 = ssub.s32 %s2584_s27, %s3091_s7 }
  0x11   : > { %p2341_p8 = scmp.lt.s32.totalorder %s2588_s28, 4  ;;  %s37_s13 = sor.u32 %s36_s9, %s35_s12 }
  0x12   : > { %s227_s14 = sand.u32 1, %s2568_s23   ;;  %p38_p9 = scmp.eq.s32.totalorder %s37_s13, 0 }
  0x13   : > { %s1892_s15 = sshll.u32 %s227_s14, 8  ;;  %s1894_s16 = sshll.u32 %s2580_s26, 1 }
  0x14   : > { %s2697_s17 = scalar_select %p38_p9, %s2568_s23, %s40_s8  }
  0x15   : > { %s2040_s18 = sshll.u32 %s2584_s27, 7  ;;  %s231_s20 = scalar_lea.vmem [#allocation3], %s1892_s15 }
  0x16   : > { %s238_s19 = sadd.s32 %s2040_s18, %s1894_s16  ;;  %s241_s21 = sshll.u32 %s231_s20, 4  ;;  %s2700_s21 = int_to_ptr.vmem [resolvable:$true] %s241_s21 }
  0x17   : > { %s1896_s29 = sshll.u32 %s238_s19, 6  ;;  %p2711_p10 = pnand %p2341_p8, %p2681_p5 }
  0x18   : > { %s2705_s3 = scalar_lea.hbm %s3062_s0, %s1896_s29  ;;  %s2715_s9 = scalar_lea.sflag [#allocation4], %s227_s14 }
  0x19   : > { %s2492_s12 = scalar_lea.hbm %s2705_s3, 4096  ;;  %p2494_p12 = pneg %p2711_p10 }
  0x1a   : > { %p2493_p11 = scmp.ne.s32.totalorder %s2705_s3, %s2492_s12  ;;  %s2497_s10 = scalar_lea.hbm %s3062_s0, 16384 }
  0x1b   : > { %p2498_p1 = scmp.lt.u32.totalorder %s2705_s3, %s3062_s0  ;;  %p2499_p2 = scmp.lt.u32.totalorder %s2497_s10, %s2492_s12 }
  0x1c   : > { %p2495_p13 = pnand %p2494_p12, %p2493_p11  ;;  %p2501_p4 = scmp.lt.u32.totalorder %s2492_s12, %s2705_s3 }
  0x1d   : > { %p2500_p3 = por %p2499_p2, %p2498_p1 }
  0x1e   : > { %p2496_p0 = pneg %p2495_p13 }
  0x1f   : > { %p2502_p5 = por %p2501_p4, %p2500_p3 }
  0x21   : > { %p2503_p6 = pnand %p2502_p5, %p2496_p0 }
  0x23   : > { %2506 = shalt.err (!%p2503_p6)
}
  0x24   : > { %s2507_s14 = scalar_lea.vmem %s2700_s21, 4096  ;;  %s2590_s16 = smov [#allocation3]  }
  0x25   : > { %p2508_p8 = scmp.ne.s32.totalorder %s2700_s21, %s2507_s14  ;;  %s2512_s18 = sshll.u32 %s2590_s16, 4  ;;  %s2513_s18 = int_to_ptr.vmem [resolvable:$false] %s2512_s18 }
  0x26   : > { %s2514_s19 = scalar_lea.vmem %s2513_s18, 8192  ;;  %p2515_p13 = scmp.lt.s32.totalorder %s2700_s21, %s2513_s18 }
  0x27   : > { %p2510_p9 = pnand %p2508_p8, %p2494_p12  ;;  %p2516_p1 = scmp.lt.s32.totalorder %s2514_s19, %s2507_s14 }
  0x29   : > { %p2511_p11 = pneg %p2510_p9  ;;  %p2517_p2 = por %p2516_p1, %p2515_p13 }
  0x2b   : > { %p2518_p3 = pnand %p2517_p2, %p2511_p11 }
  0x2d   : > { %2521 = shalt.err (!%p2518_p3)
}
  0x2e   : > { %s2591_s20 = smov 256   ;;  %s2592_s29 = smov 128  }
  0x2f   : > { %s2593_s12 = smov 8   ;;  %p1897_p12 = scmp.ge.s32.totalorder %s2588_s28, 1 }
  0x30   : > { %2340 = dma.hbm_to_vmem [thread:$0]  (!%p2711_p10), %s2705_s3, 4096, %s2700_s21, %s2715_s9, %s2591_s20, %s2592_s29, %s2593_s12  }
  0x31   : > { %p267_p0 = scmp.lt.s32.totalorder %s2588_s28, 5 }
  0x33   : > { %p268_p4 = pnand %p1897_p12, %p267_p0 }
  0x34   : > { %s273_s5 = sand.u32 (!%p268_p4), 1, %s2564_s22  }
  0x35   : > { %271 = sbr.rel (%p268_p4) target bundleno = 656 (0x290), region = 44  ;;  %s1898_s30 = sshll.u32 (!%p268_p4), %s273_s5, 8 }
  0x36   : > { %s274_s10 = scalar_lea.sflag (!%p268_p4), [#allocation4], %s273_s5  ;;  %s2746_s13 = scalar_lea.vmem (!%p268_p4), [#allocation3], %s1898_s30 }
  0x3c   : > { %2555 = dma.done.wait (%p2687_p7), %s274_s10, 4096  }
  0x3d   : > { %2557 = vsyncadd (%p2687_p7), %s274_s10, 4294963200  ;;  %s1899_s8 = sshll.u32 %s2572_s24, 5  ;;  %s1901_s3 = sshll.u32 %s2576_s25, 5 }
  0x3e   : > { %p319_p10 = scmp.lt.s32.totalorder %s1899_s8, 63  ;;  %p325_p5 = scmp.lt.s32.totalorder %s1901_s3, 63 }
  0x3f   : > { %p1905_p7 = scmp.ne.s32.totalorder %s2572_s24, 0 }
  0x40   : > { %s3093_s8 = smov (!%p319_p10, %s1899_s8), 63  ;;  %s3095_s3 = smov (!%p325_p5, %s1901_s3), 63 }
  0x41   : > { %s1900_s21 = sshll.u32 %s3093_s8, 2  ;;  %s1902_s16 = sshll.u32 %s3095_s3, 2  ;;  %vm341_vm0 = vcmask (!%p1905_p7), 130048   ;;  %v2594_v0 = vmov (!%p1905_p7), 0.0  }
  0x42   : > { %s2757_s14 = scalar_lea.vmem %s3063_s1, %s1900_s21  ;;  %s2762_s11 = scalar_lea.vmem %s3064_s2, %s1902_s16  ;;  %342 = vst.msk [vmem:[#allocation2] sm:$0xff] (!%p1905_p7), %vm341_vm0, %v2594_v0  ;;  %343 = vst.msk [vmem:[#allocation2 + $0x8] sm:$0xff] (!%p1905_p7), %vm341_vm0, %v2594_v0 }
  0x43   : > { %s2767_s25 = scalar_lea.vmem %s3068_s6, %s1902_s16  ;;  %340 = sbr.rel (%p1905_p7) target bundleno = 82 (0x52), region = 52  ;;  %344 = vst.msk [vmem:[#allocation2 + $0x10] sm:$0xff] (!%p1905_p7), %vm341_vm0, %v2594_v0  ;;  %345 = vst.msk [vmem:[#allocation2 + $0x18] sm:$0xff] (!%p1905_p7), %vm341_vm0, %v2594_v0 }
  0x44   : > { %346 = vst.msk [vmem:[#allocation2 + $0x20] sm:$0xff] (!%p1905_p7), %vm341_vm0, %v2594_v0  ;;  %347 = vst.msk [vmem:[#allocation2 + $0x28] sm:$0xff] (!%p1905_p7), %vm341_vm0, %v2594_v0 }
  0x45   : > { %348 = vst.msk [vmem:[#allocation2 + $0x30] sm:$0xff] (!%p1905_p7), %vm341_vm0, %v2594_v0  ;;  %349 = vst.msk [vmem:[#allocation2 + $0x38] sm:$0xff] (!%p1905_p7), %vm341_vm0, %v2594_v0 }
  0x46   : > { %350 = vst.msk [vmem:[#allocation2 + $0x40] sm:$0xff] (!%p1905_p7), %vm341_vm0, %v2594_v0  ;;  %351 = vst.msk [vmem:[#allocation2 + $0x48] sm:$0xff] (!%p1905_p7), %vm341_vm0, %v2594_v0 }
  0x47   : > { %352 = vst.msk [vmem:[#allocation2 + $0x50] sm:$0xff] (!%p1905_p7), %vm341_vm0, %v2594_v0  ;;  %353 = vst.msk [vmem:[#allocation2 + $0x58] sm:$0xff] (!%p1905_p7), %vm341_vm0, %v2594_v0 }
  0x48   : > { %354 = vst.msk [vmem:[#allocation2 + $0x60] sm:$0xff] (!%p1905_p7), %vm341_vm0, %v2594_v0  ;;  %355 = vst.msk [vmem:[#allocation2 + $0x68] sm:$0xff] (!%p1905_p7), %vm341_vm0, %v2594_v0 }
  0x49   : > { %356 = vst.msk [vmem:[#allocation2 + $0x70] sm:$0xff] (!%p1905_p7), %vm341_vm0, %v2594_v0  ;;  %357 = vst.msk [vmem:[#allocation2 + $0x78] sm:$0xff] (!%p1905_p7), %vm341_vm0, %v2594_v0 }
  0x4a   : > { %358 = vst.msk [vmem:[#allocation2 + $0x80] sm:$0xff] %vm341_vm0, %v2594_v0  ;;  %359 = vst.msk [vmem:[#allocation2 + $0x88] sm:$0xff] %vm341_vm0, %v2594_v0 }
  0x4b   : > { %360 = vst.msk [vmem:[#allocation2 + $0x90] sm:$0xff] %vm341_vm0, %v2594_v0  ;;  %361 = vst.msk [vmem:[#allocation2 + $0x98] sm:$0xff] %vm341_vm0, %v2594_v0 }
  0x4c   : > { %362 = vst.msk [vmem:[#allocation2 + $0xa0] sm:$0xff] %vm341_vm0, %v2594_v0  ;;  %363 = vst.msk [vmem:[#allocation2 + $0xa8] sm:$0xff] %vm341_vm0, %v2594_v0 }
  0x4d   : > { %364 = vst.msk [vmem:[#allocation2 + $0xb0] sm:$0xff] %vm341_vm0, %v2594_v0  ;;  %365 = vst.msk [vmem:[#allocation2 + $0xb8] sm:$0xff] %vm341_vm0, %v2594_v0 }
  0x4e   : > { %366 = vst.msk [vmem:[#allocation2 + $0xc0] sm:$0xff] %vm341_vm0, %v2594_v0  ;;  %367 = vst.msk [vmem:[#allocation2 + $0xc8] sm:$0xff] %vm341_vm0, %v2594_v0 }
  0x4f   : > { %368 = vst.msk [vmem:[#allocation2 + $0xd0] sm:$0xff] %vm341_vm0, %v2594_v0  ;;  %369 = vst.msk [vmem:[#allocation2 + $0xd8] sm:$0xff] %vm341_vm0, %v2594_v0 }
  0x50   : > { %370 = vst.msk [vmem:[#allocation2 + $0xe0] sm:$0xff] %vm341_vm0, %v2594_v0  ;;  %371 = vst.msk [vmem:[#allocation2 + $0xe8] sm:$0xff] %vm341_vm0, %v2594_v0 }
  0x51   : > { %372 = vst.msk [vmem:[#allocation2 + $0xf0] sm:$0xff] %vm341_vm0, %v2594_v0  ;;  %373 = vst.msk [vmem:[#allocation2 + $0xf8] sm:$0xff] %vm341_vm0, %v2594_v0 }
  0x52 PF: > { %v2410_v1 = vld [vmem:[%s2757_s14 + $0x40] sm:$0xff]   ;;  %v2412_v3 = vld [vmem:[%s2757_s14 + $0x48] sm:$0xff]   ;;  %v2414_v5 = vld [vmem:[%s2757_s14 + $0x50] sm:$0xff]   ;;  %vm919_vm1 = vcmask 130048   ;;  %p1954_p6 = scmp.ne.s32.totalorder %s2572_s24, 1 }
  0x53   : > { %v2411_v2 = vld [vmem:[%s2757_s14] sm:$0xff]   ;;  %2073 = vmatprep.subr.bf16.mxu0 %v2410_v1  ;;  %2287 = vmatprep.subr.bf16.mxu1 %v2410_v1  ;;  %v2413_v4 = vld [vmem:[%s2757_s14 + $0x8] sm:$0xff]   ;;  %v2415_v6 = vld [vmem:[%s2757_s14 + $0x10] sm:$0xff]   ;;  %s3077_s3 = sld [smem:[#allocation8_spill]] (!%p1954_p6)  ;;  %vm1749_vm2 = vcmask (!%p1954_p6), 257024  }
  0x54   : > { %2074 = vmatpush3.bf16.msra.mxu0 %v2411_v2  ;;  %2295 = vmatpush3.bf16.msra.mxu1 %v2411_v2  ;;  %v2416_v7 = vld [vmem:[%s2757_s14 + $0x58] sm:$0xff]   ;;  %v2418_v9 = vld [vmem:[%s2757_s14 + $0x60] sm:$0xff]   ;;  %v2420_v11 = vld [vmem:[%s2757_s14 + $0x68] sm:$0xff]  }
  0x55   : > { %2075 = vmatprep.subr.bf16.mxu0 %v2412_v3  ;;  %2288 = vmatprep.subr.bf16.mxu1 %v2412_v3  ;;  %v2417_v8 = vld [vmem:[%s2757_s14 + $0x18] sm:$0xff]   ;;  %v2419_v10 = vld [vmem:[%s2757_s14 + $0x20] sm:$0xff]   ;;  %v2421_v14 = vld [vmem:[%s2757_s14 + $0x28] sm:$0xff]  }
  0x56   : > { %v2428_v12 = vld [vmem:[%s2746_s13 + $0x4] ss:$8 sps:$4 sm:$0xff]   ;;  %v2422_v15 = vld [vmem:[%s2757_s14 + $0x70] sm:$0xff]   ;;  %v2424_v17 = vld [vmem:[%s2757_s14 + $0x78] sm:$0xff]  }
  0x57   : > { %v2431_v13 = vld [vmem:[%s2746_s13 + $0x84] ss:$8 sps:$4 sm:$0xff]   ;;  %758 = vmatprep.mubr.bf16.mxu0 %v2428_v12  ;;  %v2423_v16 = vld [vmem:[%s2757_s14 + $0x30] sm:$0xff]   ;;  %v2425_v18 = vld [vmem:[%s2757_s14 + $0x38] sm:$0xff]  }
  0x58   : > { %2076 = vmatpush3.bf16.msra.mxu0 %v2413_v4  ;;  %2296 = vmatpush3.bf16.msra.mxu1 %v2413_v4  ;;  %v2426_v19 = vld [vmem:[%s2746_s13] ss:$8 sps:$4 sm:$0xff]   ;;  %v2432_v21 = vld [vmem:[%s2746_s13 + $0x14] ss:$8 sps:$4 sm:$0xff]   ;;  %v2436_v23 = vld [vmem:[%s2746_s13 + $0x10] ss:$8 sps:$4 sm:$0xff]  }
  0x59   : > { %2077 = vmatprep.subr.bf16.mxu0 %v2414_v5  ;;  %2289 = vmatprep.subr.bf16.mxu1 %v2414_v5  ;;  %v2429_v20 = vld [vmem:[%s2746_s13 + $0x80] ss:$8 sps:$4 sm:$0xff]   ;;  %v2434_v22 = vld [vmem:[%s2746_s13 + $0x94] ss:$8 sps:$4 sm:$0xff]   ;;  %v2437_v24 = vld [vmem:[%s2746_s13 + $0x90] ss:$8 sps:$4 sm:$0xff]  }
  0x5a   : > { %822 = vmatprep.mubr.bf16.mxu1 %v2431_v13  ;;  %v2438_v25 = vld [vmem:[%s2746_s13 + $0x24] ss:$8 sps:$4 sm:$0xff]   ;;  %v2442_v27 = vld [vmem:[%s2746_s13 + $0x20] ss:$8 sps:$4 sm:$0xff]   ;;  %v2444_v29 = vld [vmem:[%s2746_s13 + $0x34] ss:$8 sps:$4 sm:$0xff]  }
  0x5b   : > { %v2440_v26 = vld [vmem:[%s2746_s13 + $0xa4] ss:$8 sps:$4 sm:$0xff]   ;;  %v2443_v28 = vld [vmem:[%s2746_s13 + $0xa0] ss:$8 sps:$4 sm:$0xff]   ;;  %v2446_v30 = vld [vmem:[%s2746_s13 + $0xb4] ss:$8 sps:$4 sm:$0xff]  }
  0x5c   : > { %2078 = vmatpush3.bf16.msra.mxu0 %v2415_v6  ;;  %2297 = vmatpush3.bf16.msra.mxu1 %v2415_v6  ;;  %v2448_v31 = vld [vmem:[%s2746_s13 + $0x30] ss:$8 sps:$4 sm:$0xff]   ;;  %v2450_v33 = vld [vmem:[%s2746_s13 + $0x44] ss:$8 sps:$4 sm:$0xff]   ;;  %v2454_v35 = vld [vmem:[%s2746_s13 + $0x40] ss:$8 sps:$4 sm:$0xff]  }
  0x5d   : > { %2079 = vmatprep.subr.bf16.mxu0 %v2416_v7  ;;  %2290 = vmatprep.subr.bf16.mxu1 %v2416_v7  ;;  %v2449_v32 = vld [vmem:[%s2746_s13 + $0xb0] ss:$8 sps:$4 sm:$0xff]   ;;  %v2452_v34 = vld [vmem:[%s2746_s13 + $0xc4] ss:$8 sps:$4 sm:$0xff]   ;;  %v2455_v36 = vld [vmem:[%s2746_s13 + $0xc0] ss:$8 sps:$4 sm:$0xff]  }
  0x5e   : > { %v2456_v37 = vld [vmem:[%s2746_s13 + $0x54] ss:$8 sps:$4 sm:$0xff]   ;;  %v2460_v39 = vld [vmem:[%s2746_s13 + $0x50] ss:$8 sps:$4 sm:$0xff]   ;;  %v2462_v41 = vld [vmem:[%s2746_s13 + $0x64] ss:$8 sps:$4 sm:$0xff]  }
  0x5f   : > { %v2458_v38 = vld [vmem:[%s2746_s13 + $0xd4] ss:$8 sps:$4 sm:$0xff]   ;;  %v2461_v40 = vld [vmem:[%s2746_s13 + $0xd0] ss:$8 sps:$4 sm:$0xff]   ;;  %v2464_v42 = vld [vmem:[%s2746_s13 + $0xe4] ss:$8 sps:$4 sm:$0xff]  }
  0x60   : > { %2080 = vmatpush3.bf16.msra.mxu0 %v2417_v8  ;;  %2298 = vmatpush3.bf16.msra.mxu1 %v2417_v8  ;;  %v2466_v43 = vld [vmem:[%s2746_s13 + $0x60] ss:$8 sps:$4 sm:$0xff]   ;;  %v2468_v45 = vld [vmem:[%s2746_s13 + $0x74] ss:$8 sps:$4 sm:$0xff]   ;;  %v2472_v47 = vld [vmem:[%s2746_s13 + $0x70] ss:$8 sps:$4 sm:$0xff]  }
  0x61   : > { %2081 = vmatprep.subr.bf16.mxu0 %v2418_v9  ;;  %2291 = vmatprep.subr.bf16.mxu1 %v2418_v9  ;;  %v2467_v44 = vld [vmem:[%s2746_s13 + $0xe0] ss:$8 sps:$4 sm:$0xff]   ;;  %v2470_v46 = vld [vmem:[%s2746_s13 + $0xf4] ss:$8 sps:$4 sm:$0xff]   ;;  %v2473_v48 = vld [vmem:[%s2746_s13 + $0xf0] ss:$8 sps:$4 sm:$0xff]  }
  0x62   : > { %v374_v51 = vld [vmem:[#allocation2] sm:$0xff]  ;;  %v375_v59 = vld [vmem:[#allocation2 + $0x8] sm:$0xff]  ;;  %v376_v7 = vld [vmem:[#allocation2 + $0x10] sm:$0xff]  ;;  %s3076_s13 = sld [smem:[#allocation7_spill]] (!%p1954_p6) }
  0x63   : > { %v390_v53 = vld [vmem:[#allocation2 + $0x80] sm:$0xff]  ;;  %v391_v61 = vld [vmem:[#allocation2 + $0x88] sm:$0xff]  ;;  %v392_v9 = vld [vmem:[#allocation2 + $0x90] sm:$0xff] }
  0x64   : > { %2082 = vmatpush3.bf16.msra.mxu0 %v2419_v10  ;;  %2299 = vmatpush3.bf16.msra.mxu1 %v2419_v10 }
  0x65   : > { %2083 = vmatprep.subr.bf16.mxu0 %v2420_v11  ;;  %2292 = vmatprep.subr.bf16.mxu1 %v2420_v11 }
  0x68   : > { %2084 = vmatpush3.bf16.msra.mxu0 %v2421_v14  ;;  %2300 = vmatpush3.bf16.msra.mxu1 %v2421_v14 }
  0x69   : > { %2085 = vmatprep.subr.bf16.mxu0 %v2422_v15  ;;  %2293 = vmatprep.subr.bf16.mxu1 %v2422_v15  ;;  %v377_v15 = vld [vmem:[#allocation2 + $0x18] sm:$0xff] }
  0x6c   : > { %2086 = vmatpush3.bf16.msra.mxu0 %v2423_v16  ;;  %2301 = vmatpush3.bf16.msra.mxu1 %v2423_v16 }
  0x6d   : > { %2087 = vmatprep.subr.bf16.mxu0 %v2424_v17  ;;  %2294 = vmatprep.subr.bf16.mxu1 %v2424_v17  ;;  %v393_v17 = vld [vmem:[#allocation2 + $0x98] sm:$0xff] }
  0x70   : > { %2088 = vmatpush3.bf16.msra.mxu0 %v2425_v18  ;;  %2302 = vmatpush3.bf16.msra.mxu1 %v2425_v18 }
  0x73   : > { %759 = vmatmul.mubr.bf16.vlgmr.msra.gmra.mrb[0].mxu0 %v2426_v19  ;;  %823 = vmatmul.mubr.bf16.vlgmr.msra.gmra.mrb[0].mxu1 %v2429_v20 }
  0x74   : > { %766 = vmatprep.mubr.bf16.mxu0 %v2432_v21  ;;  %830 = vmatprep.mubr.bf16.mxu1 %v2434_v22 }
  0x7b   : > { %767 = vmatmul.mubr.bf16.gmra.mrb[4].mxu0 %v2436_v23  ;;  %831 = vmatmul.mubr.bf16.gmra.mrb[4].mxu1 %v2437_v24 }
  0x7c   : > { %774 = vmatprep.mubr.bf16.mxu0 %v2438_v25  ;;  %838 = vmatprep.mubr.bf16.mxu1 %v2440_v26 }
  0x83   : > { %775 = vmatmul.mubr.bf16.gmra.mrb[8].mxu0 %v2442_v27  ;;  %839 = vmatmul.mubr.bf16.gmra.mrb[8].mxu1 %v2443_v28  ;;  %v378_v27 = vld [vmem:[#allocation2 + $0x20] sm:$0xff] }
  0x84   : > { %782 = vmatprep.mubr.bf16.mxu0 %v2444_v29  ;;  %846 = vmatprep.mubr.bf16.mxu1 %v2446_v30  ;;  %v394_v29 = vld [vmem:[#allocation2 + $0xa0] sm:$0xff] }
  0x8b   : > { %783 = vmatmul.mubr.bf16.gmra.mrb[12].mxu0 %v2448_v31  ;;  %847 = vmatmul.mubr.bf16.gmra.mrb[12].mxu1 %v2449_v32 }
  0x8c   : > { %790 = vmatprep.mubr.bf16.mxu0 %v2450_v33  ;;  %854 = vmatprep.mubr.bf16.mxu1 %v2452_v34 }
  0x93   : > { %791 = vmatmul.mubr.bf16.gmra.mrb[16].mxu0 %v2454_v35  ;;  %855 = vmatmul.mubr.bf16.gmra.mrb[16].mxu1 %v2455_v36  ;;  %v379_v35 = vld [vmem:[#allocation2 + $0x28] sm:$0xff] }
  0x94   : > { %798 = vmatprep.mubr.bf16.mxu0 %v2456_v37  ;;  %862 = vmatprep.mubr.bf16.mxu1 %v2458_v38  ;;  %v395_v37 = vld [vmem:[#allocation2 + $0xa8] sm:$0xff] }
  0x9b   : > { %799 = vmatmul.mubr.bf16.gmra.mrb[20].mxu0 %v2460_v39  ;;  %863 = vmatmul.mubr.bf16.gmra.mrb[20].mxu1 %v2461_v40 }
  0x9c   : > { %806 = vmatprep.mubr.bf16.mxu0 %v2462_v41  ;;  %870 = vmatprep.mubr.bf16.mxu1 %v2464_v42 }
  0xa3   : > { %807 = vmatmul.mubr.bf16.gmra.mrb[24].mxu0 %v2466_v43  ;;  %871 = vmatmul.mubr.bf16.gmra.mrb[24].mxu1 %v2467_v44 }
  0xa4   : > { %814 = vmatprep.mubr.bf16.mxu0 %v2468_v45  ;;  %878 = vmatprep.mubr.bf16.mxu1 %v2470_v46 }
  0xab   : > { %815 = vmatmul.mubr.bf16.gmra.mrb[28].mxu0 %v2472_v47  ;;  %879 = vmatmul.mubr.bf16.gmra.mrb[28].mxu1 %v2473_v48  ;;  %v380_v47 = vld [vmem:[#allocation2 + $0x30] sm:$0xff] }
 0x146   : > { %v2089_v49 = vpop.f32.mrb[0].mxu0  ;;  %v2137_v50 = vpop.f32.mrb[0].mxu1 }
 0x147   : > { %v2090_v52 = vpop.f32.mrb[1].mxu0  ;;  %v2138_v54 = vpop.f32.mrb[1].mxu1 }
 0x148   : > { %v2091_v55 = vadd.f32 %v2090_v52, %v2089_v49  ;;  %v2139_v56 = vadd.f32 %v2138_v54, %v2137_v50  ;;  %v2092_v57 = vpop.f32.mrb[2].mxu0  ;;  %v2140_v58 = vpop.f32.mrb[2].mxu1  ;;  %v396_v49 = vld [vmem:[#allocation2 + $0xb0] sm:$0xff] }
 0x149   : > { %v2093_v60 = vpop.f32.mrb[3].mxu0  ;;  %v2141_v62 = vpop.f32.mrb[3].mxu1 }
 0x14a   : > { %v887_v63 = vadd.f32 %v2091_v55, %v374_v51  ;;  %v903_v0 = vadd.f32 %v2139_v56, %v390_v53  ;;  %v2094_v1 = vadd.f32 %v2093_v60, %v2092_v57  ;;  %v2142_v2 = vadd.f32 %v2141_v62, %v2140_v58  ;;  %v381_v55 = vld [vmem:[#allocation2 + $0x38] sm:$0xff] }
 0x14b   : > { %v397_v57 = vld [vmem:[#allocation2 + $0xb8] sm:$0xff] }
 0x14c   : > { %920 = vst.msk [vmem:[#allocation2] sm:$0xff] %vm919_vm1, %v887_v63  ;;  %936 = vst.msk [vmem:[#allocation2 + $0x80] sm:$0xff] %vm919_vm1, %v903_v0  ;;  %v888_v3 = vadd.f32 %v2094_v1, %v375_v59  ;;  %v904_v4 = vadd.f32 %v2142_v2, %v391_v61 }
 0x14e   : > { %921 = vst.msk [vmem:[#allocation2 + $0x8] sm:$0xff] %vm919_vm1, %v888_v3  ;;  %937 = vst.msk [vmem:[#allocation2 + $0x88] sm:$0xff] %vm919_vm1, %v904_v4  ;;  %v2095_v5 = vpop.f32.mrb[4].mxu0  ;;  %v2143_v6 = vpop.f32.mrb[4].mxu1  ;;  %v382_v3 = vld [vmem:[#allocation2 + $0x40] sm:$0xff] }
 0x14f   : > { %v2096_v8 = vpop.f32.mrb[5].mxu0  ;;  %v2144_v10 = vpop.f32.mrb[5].mxu1 }
 0x150   : > { %v2097_v11 = vadd.f32 %v2096_v8, %v2095_v5  ;;  %v2145_v12 = vadd.f32 %v2144_v10, %v2143_v6  ;;  %v2098_v13 = vpop.f32.mrb[6].mxu0  ;;  %v2146_v14 = vpop.f32.mrb[6].mxu1  ;;  %v398_v5 = vld [vmem:[#allocation2 + $0xc0] sm:$0xff] }
 0x151   : > { %v2099_v16 = vpop.f32.mrb[7].mxu0  ;;  %v2147_v18 = vpop.f32.mrb[7].mxu1 }
 0x152   : > { %v889_v19 = vadd.f32 %v2097_v11, %v376_v7  ;;  %v905_v20 = vadd.f32 %v2145_v12, %v392_v9  ;;  %v2100_v21 = vadd.f32 %v2099_v16, %v2098_v13  ;;  %v2148_v22 = vadd.f32 %v2147_v18, %v2146_v14  ;;  %v383_v11 = vld [vmem:[#allocation2 + $0x48] sm:$0xff] }
 0x153   : > { %v399_v13 = vld [vmem:[#allocation2 + $0xc8] sm:$0xff] }
 0x154   : > { %922 = vst.msk [vmem:[#allocation2 + $0x10] sm:$0xff] %vm919_vm1, %v889_v19  ;;  %938 = vst.msk [vmem:[#allocation2 + $0x90] sm:$0xff] %vm919_vm1, %v905_v20  ;;  %v890_v23 = vadd.f32 %v2100_v21, %v377_v15  ;;  %v906_v24 = vadd.f32 %v2148_v22, %v393_v17 }
 0x156   : > { %923 = vst.msk [vmem:[#allocation2 + $0x18] sm:$0xff] %vm919_vm1, %v890_v23  ;;  %939 = vst.msk [vmem:[#allocation2 + $0x98] sm:$0xff] %vm919_vm1, %v906_v24  ;;  %v2101_v25 = vpop.f32.mrb[8].mxu0  ;;  %v2149_v26 = vpop.f32.mrb[8].mxu1  ;;  %v384_v23 = vld [vmem:[#allocation2 + $0x50] sm:$0xff] }
 0x157   : > { %v2102_v28 = vpop.f32.mrb[9].mxu0  ;;  %v2150_v30 = vpop.f32.mrb[9].mxu1 }
 0x158   : > { %v2103_v31 = vadd.f32 %v2102_v28, %v2101_v25  ;;  %v2151_v32 = vadd.f32 %v2150_v30, %v2149_v26  ;;  %v2104_v33 = vpop.f32.mrb[10].mxu0  ;;  %v2152_v34 = vpop.f32.mrb[10].mxu1  ;;  %v400_v25 = vld [vmem:[#allocation2 + $0xd0] sm:$0xff] }
 0x159   : > { %v2105_v36 = vpop.f32.mrb[11].mxu0  ;;  %v2153_v38 = vpop.f32.mrb[11].mxu1 }
 0x15a   : > { %v891_v39 = vadd.f32 %v2103_v31, %v378_v27  ;;  %v907_v40 = vadd.f32 %v2151_v32, %v394_v29  ;;  %v2106_v41 = vadd.f32 %v2105_v36, %v2104_v33  ;;  %v2154_v42 = vadd.f32 %v2153_v38, %v2152_v34  ;;  %v385_v31 = vld [vmem:[#allocation2 + $0x58] sm:$0xff] }
 0x15b   : > { %v401_v33 = vld [vmem:[#allocation2 + $0xd8] sm:$0xff] }
 0x15c   : > { %924 = vst.msk [vmem:[#allocation2 + $0x20] sm:$0xff] %vm919_vm1, %v891_v39  ;;  %940 = vst.msk [vmem:[#allocation2 + $0xa0] sm:$0xff] %vm919_vm1, %v907_v40  ;;  %v892_v43 = vadd.f32 %v2106_v41, %v379_v35  ;;  %v908_v44 = vadd.f32 %v2154_v42, %v395_v37 }
 0x15e   : > { %925 = vst.msk [vmem:[#allocation2 + $0x28] sm:$0xff] %vm919_vm1, %v892_v43  ;;  %941 = vst.msk [vmem:[#allocation2 + $0xa8] sm:$0xff] %vm919_vm1, %v908_v44  ;;  %v2107_v45 = vpop.f32.mrb[12].mxu0  ;;  %v2155_v46 = vpop.f32.mrb[12].mxu1  ;;  %v386_v43 = vld [vmem:[#allocation2 + $0x60] sm:$0xff] }
 0x15f   : > { %v2108_v48 = vpop.f32.mrb[13].mxu0  ;;  %v2156_v50 = vpop.f32.mrb[13].mxu1 }
 0x160   : > { %v2109_v51 = vadd.f32 %v2108_v48, %v2107_v45  ;;  %v2157_v52 = vadd.f32 %v2156_v50, %v2155_v46  ;;  %v2110_v53 = vpop.f32.mrb[14].mxu0  ;;  %v2158_v54 = vpop.f32.mrb[14].mxu1  ;;  %v402_v45 = vld [vmem:[#allocation2 + $0xe0] sm:$0xff] }
 0x161   : > { %v2111_v56 = vpop.f32.mrb[15].mxu0  ;;  %v2159_v58 = vpop.f32.mrb[15].mxu1 }
 0x162   : > { %v893_v59 = vadd.f32 %v2109_v51, %v380_v47  ;;  %v909_v60 = vadd.f32 %v2157_v52, %v396_v49  ;;  %v2112_v61 = vadd.f32 %v2111_v56, %v2110_v53  ;;  %v2160_v62 = vadd.f32 %v2159_v58, %v2158_v54  ;;  %v387_v51 = vld [vmem:[#allocation2 + $0x68] sm:$0xff] }
 0x163   : > { %v403_v53 = vld [vmem:[#allocation2 + $0xe8] sm:$0xff] }
 0x164   : > { %926 = vst.msk [vmem:[#allocation2 + $0x30] sm:$0xff] %vm919_vm1, %v893_v59  ;;  %942 = vst.msk [vmem:[#allocation2 + $0xb0] sm:$0xff] %vm919_vm1, %v909_v60  ;;  %v894_v63 = vadd.f32 %v2112_v61, %v381_v55  ;;  %v910_v0 = vadd.f32 %v2160_v62, %v397_v57 }
 0x166   : > { %927 = vst.msk [vmem:[#allocation2 + $0x38] sm:$0xff] %vm919_vm1, %v894_v63  ;;  %943 = vst.msk [vmem:[#allocation2 + $0xb8] sm:$0xff] %vm919_vm1, %v910_v0  ;;  %v2113_v1 = vpop.f32.mrb[16].mxu0  ;;  %v2161_v2 = vpop.f32.mrb[16].mxu1  ;;  %v388_v63 = vld [vmem:[#allocation2 + $0x70] sm:$0xff] }
 0x167   : > { %v2114_v4 = vpop.f32.mrb[17].mxu0  ;;  %v2162_v6 = vpop.f32.mrb[17].mxu1 }
 0x168   : > { %v2115_v7 = vadd.f32 %v2114_v4, %v2113_v1  ;;  %v2163_v8 = vadd.f32 %v2162_v6, %v2161_v2  ;;  %v2116_v9 = vpop.f32.mrb[18].mxu0  ;;  %v2164_v10 = vpop.f32.mrb[18].mxu1  ;;  %v404_v1 = vld [vmem:[#allocation2 + $0xf0] sm:$0xff] }
 0x169   : > { %v2117_v12 = vpop.f32.mrb[19].mxu0  ;;  %v2165_v14 = vpop.f32.mrb[19].mxu1 }
 0x16a   : > { %v895_v15 = vadd.f32 %v2115_v7, %v382_v3  ;;  %v911_v16 = vadd.f32 %v2163_v8, %v398_v5  ;;  %v2118_v17 = vadd.f32 %v2117_v12, %v2116_v9  ;;  %v2166_v18 = vadd.f32 %v2165_v14, %v2164_v10  ;;  %v389_v7 = vld [vmem:[#allocation2 + $0x78] sm:$0xff] }
 0x16b   : > { %v405_v9 = vld [vmem:[#allocation2 + $0xf8] sm:$0xff] }
 0x16c   : > { %928 = vst.msk [vmem:[#allocation2 + $0x40] sm:$0xff] %vm919_vm1, %v895_v15  ;;  %944 = vst.msk [vmem:[#allocation2 + $0xc0] sm:$0xff] %vm919_vm1, %v911_v16  ;;  %v896_v19 = vadd.f32 %v2118_v17, %v383_v11  ;;  %v912_v20 = vadd.f32 %v2166_v18, %v399_v13  ;;  %v2474_v17 = vld [vmem:[%s3066_s4] sm:$0xff] (!%p1954_p6)  }
 0x16d   : > { %v2475_v18 = vld [vmem:[%s3076_s13] sm:$0xff] (!%p1954_p6)   ;;  %2219 = vmatprep.subr.bf16.mxu1 (!%p1954_p6), %v2474_v17 }
 0x16e   : > { %929 = vst.msk [vmem:[#allocation2 + $0x48] sm:$0xff] %vm919_vm1, %v896_v19  ;;  %945 = vst.msk [vmem:[#allocation2 + $0xc8] sm:$0xff] %vm919_vm1, %v912_v20  ;;  %v2119_v21 = vpop.f32.mrb[20].mxu0  ;;  %v2167_v22 = vpop.f32.mrb[20].mxu1  ;;  %v956_v19 = vld [vmem:[#allocation2] sm:$0xff] (!%p1954_p6)  ;;  %v957_v20 = vld [vmem:[#allocation2 + $0x8] sm:$0xff] (!%p1954_p6)  ;;  %2253 = vmatprep.subr.bf16.mxu0 (!%p1954_p6), %v2475_v18  ;;  %2220 = vmatpush3.bf16.msra.mxu1 (!%p1954_p6), %v2474_v17 }
 0x16f   : > { %v2120_v24 = vpop.f32.mrb[21].mxu0  ;;  %v2168_v26 = vpop.f32.mrb[21].mxu1  ;;  %2254 = vmatpush3.bf16.msra.mxu0 (!%p1954_p6), %v2475_v18  ;;  %v2491_v18 = vld [vmem:[%s2762_s11 + $0x78] sm:$0xff] (!%p1954_p6)  }
 0x170   : > { %v2121_v27 = vadd.f32 %v2120_v24, %v2119_v21  ;;  %v2169_v28 = vadd.f32 %v2168_v26, %v2167_v22  ;;  %v2122_v29 = vpop.f32.mrb[22].mxu0  ;;  %v2170_v30 = vpop.f32.mrb[22].mxu1  ;;  %v988_v21 = vpack.c.bf16 (!%p1954_p6), %v957_v20, %v956_v19  ;;  %v2476_v22 = vld [vmem:[%s2762_s11] sm:$0xff] (!%p1954_p6)   ;;  %v959_v24 = vld [vmem:[#allocation2 + $0x18] sm:$0xff] (!%p1954_p6)  ;;  %v2477_v26 = vld [vmem:[%s2762_s11 + $0x8] sm:$0xff] (!%p1954_p6)  }
 0x171   : > { %v2123_v32 = vpop.f32.mrb[23].mxu0  ;;  %v2171_v34 = vpop.f32.mrb[23].mxu1  ;;  %2255 = vmatprep.mubr.msk.bf16.mxu0 (!%p1954_p6), %vm919_vm1, %v2476_v22 }
 0x172   : > { %v897_v35 = vadd.f32 %v2121_v27, %v384_v23  ;;  %v913_v36 = vadd.f32 %v2169_v28, %v400_v25  ;;  %v2124_v37 = vadd.f32 %v2123_v32, %v2122_v29  ;;  %v2172_v38 = vadd.f32 %v2171_v34, %v2170_v30  ;;  %v958_v23 = vld [vmem:[#allocation2 + $0x10] sm:$0xff] (!%p1954_p6)  ;;  %2221 = vmatprep.mubr.msk.bf16.mxu1 (!%p1954_p6), %vm919_vm1, %v988_v21  ;;  %v960_v27 = vld [vmem:[#allocation2 + $0x20] sm:$0xff] (!%p1954_p6)  ;;  %v961_v28 = vld [vmem:[#allocation2 + $0x28] sm:$0xff] (!%p1954_p6) }
 0x173   : > { %v989_v25 = vpack.c.bf16 (!%p1954_p6), %v959_v24, %v958_v23  ;;  %v990_v29 = vpack.c.bf16 (!%p1954_p6), %v961_v28, %v960_v27  ;;  %v2478_v30 = vld [vmem:[%s2762_s11 + $0x10] sm:$0xff] (!%p1954_p6)   ;;  %2256 = vmatmul.mubr.msk.bf16.vlgmr.msra.gmra.mrb[0].mxu0 (!%p1954_p6), %vm919_vm1, %v2477_v26  ;;  %v963_v32 = vld [vmem:[#allocation2 + $0x38] sm:$0xff] (!%p1954_p6)  ;;  %v2940_v21 = vld [vmem:[%s3077_s3] ss:$0 sm:$0xff] (!%p1954_p6) }
 0x174   : > { %930 = vst.msk [vmem:[#allocation2 + $0x50] sm:$0xff] %vm919_vm1, %v897_v35  ;;  %946 = vst.msk [vmem:[#allocation2 + $0xd0] sm:$0xff] %vm919_vm1, %v913_v36  ;;  %v898_v39 = vadd.f32 %v2124_v37, %v385_v31  ;;  %v914_v40 = vadd.f32 %v2172_v38, %v401_v33  ;;  %v962_v31 = vld [vmem:[#allocation2 + $0x30] sm:$0xff] (!%p1954_p6)  ;;  %2259 = vmatprep.mubr.msk.bf16.mxu0 (!%p1954_p6), %vm919_vm1, %v2478_v30  ;;  %v964_v33 = vld [vmem:[#allocation2 + $0x40] sm:$0xff] (!%p1954_p6) }
 0x175   : > { %2222 = vmatmul.mubr.msk.bf16.vlgmr.msra.gmra.mrb[0].mxu1 (!%p1954_p6), %vm919_vm1, %v989_v25  ;;  %v965_v34 = vld [vmem:[#allocation2 + $0x48] sm:$0xff] (!%p1954_p6)  ;;  %v991_v35 = vpack.c.bf16 (!%p1954_p6), %v963_v32, %v962_v31  ;;  %v2479_v36 = vld [vmem:[%s2762_s11 + $0x18] sm:$0xff] (!%p1954_p6)   ;;  %v2480_v38 = vld [vmem:[%s2762_s11 + $0x20] sm:$0xff] (!%p1954_p6)  }
 0x176   : > { %931 = vst.msk [vmem:[#allocation2 + $0x58] sm:$0xff] %vm919_vm1, %v898_v39  ;;  %947 = vst.msk [vmem:[#allocation2 + $0xd8] sm:$0xff] %vm919_vm1, %v914_v40  ;;  %v2125_v41 = vpop.f32.mrb[24].mxu0  ;;  %v2173_v42 = vpop.f32.mrb[24].mxu1  ;;  %2225 = vmatprep.mubr.msk.bf16.mxu1 (!%p1954_p6), %vm919_vm1, %v990_v29  ;;  %v992_v37 = vpack.c.bf16 (!%p1954_p6), %v965_v34, %v964_v33 }
 0x177   : > { %v2126_v44 = vpop.f32.mrb[25].mxu0  ;;  %v2174_v46 = vpop.f32.mrb[25].mxu1 }
 0x178   : > { %v2127_v47 = vadd.f32 %v2126_v44, %v2125_v41  ;;  %v2175_v48 = vadd.f32 %v2174_v46, %v2173_v42  ;;  %v2128_v49 = vpop.f32.mrb[26].mxu0  ;;  %v2176_v50 = vpop.f32.mrb[26].mxu1  ;;  %v2481_v44 = vld [vmem:[%s2762_s11 + $0x28] sm:$0xff] (!%p1954_p6)   ;;  %v2482_v46 = vld [vmem:[%s2762_s11 + $0x30] sm:$0xff] (!%p1954_p6)  }
 0x179   : > { %v2129_v52 = vpop.f32.mrb[27].mxu0  ;;  %v2177_v54 = vpop.f32.mrb[27].mxu1 }
 0x17a   : > { %v899_v55 = vadd.f32 %v2127_v47, %v386_v43  ;;  %v915_v56 = vadd.f32 %v2175_v48, %v402_v45  ;;  %v2130_v57 = vadd.f32 %v2129_v52, %v2128_v49  ;;  %v2178_v58 = vadd.f32 %v2177_v54, %v2176_v50  ;;  %v972_v49 = vld [vmem:[#allocation2 + $0x80] sm:$0xff] (!%p1954_p6)  ;;  %v973_v50 = vld [vmem:[#allocation2 + $0x88] sm:$0xff] (!%p1954_p6)  ;;  %v2483_v52 = vld [vmem:[%s2762_s11 + $0x38] sm:$0xff] (!%p1954_p6)  }
 0x17b   : > { %2260 = vmatmul.mubr.msk.bf16.gmra.mrb[4].mxu0 (!%p1954_p6), %vm919_vm1, %v2479_v36  ;;  %v966_v39 = vld [vmem:[#allocation2 + $0x50] sm:$0xff] (!%p1954_p6)  ;;  %v2484_v54 = vld [vmem:[%s2762_s11 + $0x40] sm:$0xff] (!%p1954_p6)  }
 0x17c   : > { %932 = vst.msk [vmem:[#allocation2 + $0x60] sm:$0xff] %vm919_vm1, %v899_v55  ;;  %948 = vst.msk [vmem:[#allocation2 + $0xe0] sm:$0xff] %vm919_vm1, %v915_v56  ;;  %v900_v59 = vadd.f32 %v2130_v57, %v387_v51  ;;  %v916_v60 = vadd.f32 %v2178_v58, %v403_v53  ;;  %2263 = vmatprep.mubr.msk.bf16.mxu0 (!%p1954_p6), %vm919_vm1, %v2480_v38  ;;  %v996_v53 = vpack.c.bf16 (!%p1954_p6), %v973_v50, %v972_v49  ;;  %v974_v55 = vld [vmem:[#allocation2 + $0x90] sm:$0xff] (!%p1954_p6)  ;;  %v975_v56 = vld [vmem:[#allocation2 + $0x98] sm:$0xff] (!%p1954_p6) }
 0x17d   : > { %2226 = vmatmul.mubr.msk.bf16.gmra.mrb[4].mxu1 (!%p1954_p6), %vm919_vm1, %v991_v35  ;;  %v967_v40 = vld [vmem:[#allocation2 + $0x58] sm:$0xff] (!%p1954_p6)  ;;  %v976_v57 = vld [vmem:[#allocation2 + $0xa0] sm:$0xff] (!%p1954_p6)  ;;  %v977_v58 = vld [vmem:[#allocation2 + $0xa8] sm:$0xff] (!%p1954_p6) }
 0x17e   : > { %933 = vst.msk [vmem:[#allocation2 + $0x68] sm:$0xff] %vm919_vm1, %v900_v59  ;;  %949 = vst.msk [vmem:[#allocation2 + $0xe8] sm:$0xff] %vm919_vm1, %v916_v60  ;;  %v2131_v61 = vpop.f32.mrb[28].mxu0  ;;  %v2179_v62 = vpop.f32.mrb[28].mxu1  ;;  %2229 = vmatprep.mubr.msk.bf16.mxu1 (!%p1954_p6), %vm919_vm1, %v992_v37  ;;  %v993_v43 = vpack.c.bf16 (!%p1954_p6), %v967_v40, %v966_v39  ;;  %v997_v59 = vpack.c.bf16 (!%p1954_p6), %v975_v56, %v974_v55  ;;  %v2485_v60 = vld [vmem:[%s2762_s11 + $0x48] sm:$0xff] (!%p1954_p6)  }
 0x17f   : > { %v2132_v0 = vpop.f32.mrb[29].mxu0  ;;  %v2180_v2 = vpop.f32.mrb[29].mxu1 }
 0x180   : > { %v2133_v3 = vadd.f32 %v2132_v0, %v2131_v61  ;;  %v2181_v4 = vadd.f32 %v2180_v2, %v2179_v62  ;;  %v2134_v5 = vpop.f32.mrb[30].mxu0  ;;  %v2182_v6 = vpop.f32.mrb[30].mxu1  ;;  %955 = sbr.rel (%p1954_p6) target bundleno = 656 (0x290), region = 56  ;;  %v998_v61 = vpack.c.bf16 (!%p1954_p6), %v977_v58, %v976_v57  ;;  %v2486_v62 = vld [vmem:[%s2762_s11 + $0x50] sm:$0xff] (!%p1954_p6)   ;;  %v979_v0 = vld [vmem:[#allocation2 + $0xb8] sm:$0xff] (!%p1954_p6)  ;;  %v981_v2 = vld [vmem:[#allocation2 + $0xc8] sm:$0xff] (!%p1954_p6) }
 0x181   : > { %v2135_v8 = vpop.f32.mrb[31].mxu0  ;;  %v2183_v10 = vpop.f32.mrb[31].mxu1 }
 0x182   : > { %v901_v11 = vadd.f32 %v2133_v3, %v388_v63  ;;  %v917_v12 = vadd.f32 %v2181_v4, %v404_v1  ;;  %v2136_v13 = vadd.f32 %v2135_v8, %v2134_v5  ;;  %v2184_v14 = vadd.f32 %v2183_v10, %v2182_v6  ;;  %v978_v63 = vld [vmem:[#allocation2 + $0xb0] sm:$0xff] (!%p1954_p6)  ;;  %v980_v1 = vld [vmem:[#allocation2 + $0xc0] sm:$0xff] (!%p1954_p6)  ;;  %v2487_v4 = vld [vmem:[%s2762_s11 + $0x58] sm:$0xff] (!%p1954_p6)  }
 0x183   : > { %v968_v41 = vld [vmem:[#allocation2 + $0x60] sm:$0xff] (!%p1954_p6)  ;;  %2264 = vmatmul.mubr.msk.bf16.gmra.mrb[8].mxu0 (!%p1954_p6), %vm919_vm1, %v2481_v44  ;;  %v999_v3 = vpack.c.bf16 (!%p1954_p6), %v979_v0, %v978_v63  ;;  %v1000_v5 = vpack.c.bf16 (!%p1954_p6), %v981_v2, %v980_v1  ;;  %v983_v8 = vld [vmem:[#allocation2 + $0xd8] sm:$0xff] (!%p1954_p6) }
 0x184   : > { %934 = vst.msk [vmem:[#allocation2 + $0x70] sm:$0xff] %vm919_vm1, %v901_v11  ;;  %950 = vst.msk [vmem:[#allocation2 + $0xf0] sm:$0xff] %vm919_vm1, %v917_v12  ;;  %v902_v15 = vadd.f32 %v2136_v13, %v389_v7  ;;  %v918_v16 = vadd.f32 %v2184_v14, %v405_v9  ;;  %2267 = vmatprep.mubr.msk.bf16.mxu0 (!%p1954_p6), %vm919_vm1, %v2482_v46  ;;  %v2488_v6 = vld [vmem:[%s2762_s11 + $0x60] sm:$0xff] (!%p1954_p6)   ;;  %v982_v7 = vld [vmem:[#allocation2 + $0xd0] sm:$0xff] (!%p1954_p6) }
 0x185   : > { %v969_v42 = vld [vmem:[#allocation2 + $0x68] sm:$0xff] (!%p1954_p6)  ;;  %2230 = vmatmul.mubr.msk.bf16.gmra.mrb[8].mxu1 (!%p1954_p6), %vm919_vm1, %v993_v43  ;;  %v984_v9 = vld [vmem:[#allocation2 + $0xe0] sm:$0xff] (!%p1954_p6)  ;;  %v1001_v11 = vpack.c.bf16 (!%p1954_p6), %v983_v8, %v982_v7  ;;  %v2490_v14 = vld [vmem:[%s2762_s11 + $0x70] sm:$0xff] (!%p1954_p6)  }
 0x186   : > { %935 = vst.msk [vmem:[#allocation2 + $0x78] sm:$0xff] %vm919_vm1, %v902_v15  ;;  %951 = vst.msk [vmem:[#allocation2 + $0xf8] sm:$0xff] %vm919_vm1, %v918_v16  ;;  %v994_v45 = vpack.c.bf16 (!%p1954_p6), %v969_v42, %v968_v41  ;;  %v985_v10 = vld [vmem:[#allocation2 + $0xe8] sm:$0xff] (!%p1954_p6) }
 0x187   : > { %v2489_v12 = vld [vmem:[%s2762_s11 + $0x68] sm:$0xff]   ;;  %v1002_v13 = vpack.c.bf16 %v985_v10, %v984_v9 }
 0x188   : > { %2233 = vmatprep.mubr.msk.bf16.mxu1 %vm919_vm1, %v994_v45 }
 0x18b   : > { %v970_v47 = vld [vmem:[#allocation2 + $0x70] sm:$0xff]  ;;  %2268 = vmatmul.mubr.msk.bf16.gmra.mrb[12].mxu0 %vm919_vm1, %v2483_v52 }
 0x18c   : > { %2271 = vmatprep.mubr.msk.bf16.mxu0 %vm919_vm1, %v2484_v54  ;;  %v986_v15 = vld [vmem:[#allocation2 + $0xf0] sm:$0xff] }
 0x18d   : > { %v971_v48 = vld [vmem:[#allocation2 + $0x78] sm:$0xff] }
 0x18e   : > { %v995_v51 = vpack.c.bf16 %v971_v48, %v970_v47  ;;  %v987_v16 = vld [vmem:[#allocation2 + $0xf8] sm:$0xff] }
 0x18f   : > { %v1003_v17 = vpack.c.bf16 %v987_v16, %v986_v15 }
 0x190   : > { %2234 = vmatmul.mubr.msk.bf16.gmra.mrb[12].mxu1 %vm919_vm1, %v995_v51 }
 0x191   : > { %2237 = vmatprep.mubr.msk.bf16.mxu1 %vm919_vm1, %v996_v53 }
 0x193   : > { %2272 = vmatmul.mubr.msk.bf16.gmra.mrb[16].mxu0 %vm919_vm1, %v2485_v60 }
 0x194   : > { %2275 = vmatprep.mubr.msk.bf16.mxu0 %vm919_vm1, %v2486_v62 }
 0x198   : > { %2238 = vmatmul.mubr.msk.bf16.gmra.mrb[16].mxu1 %vm919_vm1, %v997_v59 }
 0x199   : > { %2241 = vmatprep.mubr.msk.bf16.mxu1 %vm919_vm1, %v998_v61 }
 0x19b   : > { %2276 = vmatmul.mubr.msk.bf16.gmra.mrb[20].mxu0 %vm919_vm1, %v2487_v4 }
 0x19c   : > { %2279 = vmatprep.mubr.msk.bf16.mxu0 %vm919_vm1, %v2488_v6 }
 0x1a0   : > { %2242 = vmatmul.mubr.msk.bf16.gmra.mrb[20].mxu1 %vm919_vm1, %v999_v3 }
 0x1a1   : > { %2245 = vmatprep.mubr.msk.bf16.mxu1 %vm919_vm1, %v1000_v5 }
 0x1a3   : > { %2280 = vmatmul.mubr.msk.bf16.gmra.mrb[24].mxu0 %vm919_vm1, %v2489_v12 }
 0x1a4   : > { %2283 = vmatprep.mubr.msk.bf16.mxu0 %vm919_vm1, %v2490_v14 }
 0x1a8   : > { %2246 = vmatmul.mubr.msk.bf16.gmra.mrb[24].mxu1 %vm919_vm1, %v1001_v11 }
 0x1a9   : > { %2249 = vmatprep.mubr.msk.bf16.mxu1 %vm919_vm1, %v1002_v13 }
 0x1ab   : > { %2284 = vmatmul.mubr.msk.bf16.gmra.mrb[28].mxu0 %vm919_vm1, %v2491_v18 }
 0x1b0   : > { %2250 = vmatmul.mubr.msk.bf16.gmra.mrb[28].mxu1 %vm919_vm1, %v1003_v17 }
 0x246   : > { %v2257_v20 = vpop.f32.mrb[0].mxu0 }
 0x247   : > { %v1423_v24 = vpop.f32.mrb[1].mxu0 }
 0x248   : > { %v2223_v19 = vpop.f32.mrb[0].mxu1  ;;  %v2258_v27 = vpop.f32.mrb[2].mxu0 }
 0x249   : > { %v1432_v22 = vadd.f32 %v2257_v20, %v2223_v19  ;;  %v1128_v23 = vpop.f32.mrb[1].mxu1  ;;  %v1426_v31 = vpop.f32.mrb[3].mxu0 }
 0x24a   : > { %v1424_v25 = vadd.f32 %v1423_v24, %v1128_v23  ;;  %v2224_v26 = vpop.f32.mrb[2].mxu1 }
 0x24b   : > { %v1559_v28 = vadd.f32 %v2940_v21, %v1432_v22  ;;  %v1435_v29 = vadd.f32 %v2258_v27, %v2224_v26  ;;  %v1131_v30 = vpop.f32.mrb[3].mxu1 }
 0x24c   : > { %v1557_v32 = vadd.f32 %v2940_v21, %v1424_v25  ;;  %v1427_v33 = vadd.f32 %v1426_v31, %v1131_v30 }
 0x24d   : > { %v1591_v34 = vmax.f32 %v1559_v28, 0.0  ;;  %v1560_v35 = vadd.f32 %v2940_v21, %v1435_v29 }
 0x24e   : > { %v1589_v36 = vmax.f32 %v1557_v32, 0.0  ;;  %v1558_v37 = vadd.f32 %v2940_v21, %v1427_v33  ;;  %v2261_v43 = vpop.f32.mrb[4].mxu0 }
 0x24f   : > { %v2043_v38 = vpack.c.bf16 %v1591_v34, %v1591_v34  ;;  %v1592_v39 = vmax.f32 %v1560_v35, 0.0  ;;  %v1439_v47 = vpop.f32.mrb[5].mxu0 }
 0x250   : > { %v2041_v40 = vpack.c.bf16 %v1589_v36, %v1589_v36  ;;  %v1590_v41 = vmax.f32 %v1558_v37, 0.0  ;;  %v2227_v42 = vpop.f32.mrb[4].mxu1  ;;  %v2262_v51 = vpop.f32.mrb[6].mxu0 }
 0x251   : > { %1752 = vst.msk [vmem:[%s2767_s25 + $0x8] sm:$0xf] %vm1749_vm2, %v2043_v38  ;;  %v2044_v44 = vpack.c.bf16 %v1592_v39, %v1592_v39  ;;  %v1448_v45 = vadd.f32 %v2261_v43, %v2227_v42  ;;  %v1144_v46 = vpop.f32.mrb[5].mxu1  ;;  %v1442_v55 = vpop.f32.mrb[7].mxu0 }
 0x252   : > { %1750 = vst.msk [vmem:[%s2767_s25] sm:$0xf] %vm1749_vm2, %v2041_v40  ;;  %v2042_v48 = vpack.c.bf16 %v1590_v41, %v1590_v41  ;;  %v1440_v49 = vadd.f32 %v1439_v47, %v1144_v46  ;;  %v2228_v50 = vpop.f32.mrb[6].mxu1 }
 0x253   : > { %1753 = vst.msk [vmem:[%s2767_s25 + $0xc] sm:$0xf] %vm1749_vm2, %v2044_v44  ;;  %v1563_v52 = vadd.f32 %v2940_v21, %v1448_v45  ;;  %v1451_v53 = vadd.f32 %v2262_v51, %v2228_v50  ;;  %v1147_v54 = vpop.f32.mrb[7].mxu1 }
 0x254   : > { %1751 = vst.msk [vmem:[%s2767_s25 + $0x4] sm:$0xf] %vm1749_vm2, %v2042_v48  ;;  %v1561_v56 = vadd.f32 %v2940_v21, %v1440_v49  ;;  %v1443_v57 = vadd.f32 %v1442_v55, %v1147_v54 }
 0x255   : > { %v1595_v58 = vmax.f32 %v1563_v52, 0.0  ;;  %v1564_v59 = vadd.f32 %v2940_v21, %v1451_v53 }
 0x256   : > { %v1593_v60 = vmax.f32 %v1561_v56, 0.0  ;;  %v1562_v61 = vadd.f32 %v2940_v21, %v1443_v57  ;;  %v2265_v3 = vpop.f32.mrb[8].mxu0 }
 0x257   : > { %v2047_v62 = vpack.c.bf16 %v1595_v58, %v1595_v58  ;;  %v1596_v63 = vmax.f32 %v1564_v59, 0.0  ;;  %v1455_v7 = vpop.f32.mrb[9].mxu0 }
 0x258   : > { %v2045_v0 = vpack.c.bf16 %v1593_v60, %v1593_v60  ;;  %v1594_v1 = vmax.f32 %v1562_v61, 0.0  ;;  %v2231_v2 = vpop.f32.mrb[8].mxu1  ;;  %v2266_v11 = vpop.f32.mrb[10].mxu0 }
 0x259   : > { %1756 = vst.msk [vmem:[%s2767_s25 + $0x18] sm:$0xf] %vm1749_vm2, %v2047_v62  ;;  %v2048_v4 = vpack.c.bf16 %v1596_v63, %v1596_v63  ;;  %v1464_v5 = vadd.f32 %v2265_v3, %v2231_v2  ;;  %v1160_v6 = vpop.f32.mrb[9].mxu1  ;;  %v1458_v15 = vpop.f32.mrb[11].mxu0 }
 0x25a   : > { %1754 = vst.msk [vmem:[%s2767_s25 + $0x10] sm:$0xf] %vm1749_vm2, %v2045_v0  ;;  %v2046_v8 = vpack.c.bf16 %v1594_v1, %v1594_v1  ;;  %v1456_v9 = vadd.f32 %v1455_v7, %v1160_v6  ;;  %v2232_v10 = vpop.f32.mrb[10].mxu1 }
 0x25b   : > { %1757 = vst.msk [vmem:[%s2767_s25 + $0x1c] sm:$0xf] %vm1749_vm2, %v2048_v4  ;;  %v1567_v12 = vadd.f32 %v2940_v21, %v1464_v5  ;;  %v1467_v13 = vadd.f32 %v2266_v11, %v2232_v10  ;;  %v1163_v14 = vpop.f32.mrb[11].mxu1 }
 0x25c   : > { %1755 = vst.msk [vmem:[%s2767_s25 + $0x14] sm:$0xf] %vm1749_vm2, %v2046_v8  ;;  %v1565_v16 = vadd.f32 %v2940_v21, %v1456_v9  ;;  %v1459_v17 = vadd.f32 %v1458_v15, %v1163_v14 }
 0x25d   : > { %v1599_v18 = vmax.f32 %v1567_v12, 0.0  ;;  %v1568_v19 = vadd.f32 %v2940_v21, %v1467_v13 }
 0x25e   : > { %v1597_v20 = vmax.f32 %v1565_v16, 0.0  ;;  %v1566_v22 = vadd.f32 %v2940_v21, %v1459_v17  ;;  %v2269_v28 = vpop.f32.mrb[12].mxu0 }
 0x25f   : > { %v2051_v23 = vpack.c.bf16 %v1599_v18, %v1599_v18  ;;  %v1600_v24 = vmax.f32 %v1568_v19, 0.0  ;;  %v1471_v32 = vpop.f32.mrb[13].mxu0 }
 0x260   : > { %v2049_v25 = vpack.c.bf16 %v1597_v20, %v1597_v20  ;;  %v1598_v26 = vmax.f32 %v1566_v22, 0.0  ;;  %v2270_v36 = vpop.f32.mrb[14].mxu0 }
 0x261   : > { %1760 = vst.msk [vmem:[%s2767_s25 + $0x28] sm:$0xf] %vm1749_vm2, %v2051_v23  ;;  %v2052_v29 = vpack.c.bf16 %v1600_v24, %v1600_v24  ;;  %v1474_v40 = vpop.f32.mrb[15].mxu0 }
 0x262   : > { %1758 = vst.msk [vmem:[%s2767_s25 + $0x20] sm:$0xf] %vm1749_vm2, %v2049_v25  ;;  %v2050_v33 = vpack.c.bf16 %v1598_v26, %v1598_v26 }
 0x263   : > { %v2235_v27 = vpop.f32.mrb[12].mxu1  ;;  %1761 = vst.msk [vmem:[%s2767_s25 + $0x2c] sm:$0xf] %vm1749_vm2, %v2052_v29 }
 0x264   : > { %v1480_v30 = vadd.f32 %v2269_v28, %v2235_v27  ;;  %v1176_v31 = vpop.f32.mrb[13].mxu1  ;;  %1759 = vst.msk [vmem:[%s2767_s25 + $0x24] sm:$0xf] %vm1749_vm2, %v2050_v33 }
 0x265   : > { %v1472_v34 = vadd.f32 %v1471_v32, %v1176_v31  ;;  %v2236_v35 = vpop.f32.mrb[14].mxu1 }
 0x266   : > { %v1571_v37 = vadd.f32 %v2940_v21, %v1480_v30  ;;  %v1483_v38 = vadd.f32 %v2270_v36, %v2236_v35  ;;  %v1179_v39 = vpop.f32.mrb[15].mxu1  ;;  %v2273_v52 = vpop.f32.mrb[16].mxu0 }
 0x267   : > { %v1569_v41 = vadd.f32 %v2940_v21, %v1472_v34  ;;  %v1475_v42 = vadd.f32 %v1474_v40, %v1179_v39  ;;  %v1487_v56 = vpop.f32.mrb[17].mxu0 }
 0x268   : > { %v1603_v43 = vmax.f32 %v1571_v37, 0.0  ;;  %v1572_v44 = vadd.f32 %v2940_v21, %v1483_v38  ;;  %v2274_v60 = vpop.f32.mrb[18].mxu0 }
 0x269   : > { %v1601_v45 = vmax.f32 %v1569_v41, 0.0  ;;  %v1570_v46 = vadd.f32 %v2940_v21, %v1475_v42  ;;  %v1490_v0 = vpop.f32.mrb[19].mxu0 }
 0x26a   : > { %v2055_v47 = vpack.c.bf16 %v1603_v43, %v1603_v43  ;;  %v1604_v48 = vmax.f32 %v1572_v44, 0.0 }
 0x26b   : > { %v2053_v49 = vpack.c.bf16 %v1601_v45, %v1601_v45  ;;  %v1602_v50 = vmax.f32 %v1570_v46, 0.0  ;;  %v2239_v51 = vpop.f32.mrb[16].mxu1 }
 0x26c   : > { %1764 = vst.msk [vmem:[%s2767_s25 + $0x38] sm:$0xf] %vm1749_vm2, %v2055_v47  ;;  %v2056_v53 = vpack.c.bf16 %v1604_v48, %v1604_v48  ;;  %v1496_v54 = vadd.f32 %v2273_v52, %v2239_v51  ;;  %v1192_v55 = vpop.f32.mrb[17].mxu1 }
 0x26d   : > { %1762 = vst.msk [vmem:[%s2767_s25 + $0x30] sm:$0xf] %vm1749_vm2, %v2053_v49  ;;  %v2054_v57 = vpack.c.bf16 %v1602_v50, %v1602_v50  ;;  %v1488_v58 = vadd.f32 %v1487_v56, %v1192_v55  ;;  %v2240_v59 = vpop.f32.mrb[18].mxu1 }
 0x26e   : > { %1765 = vst.msk [vmem:[%s2767_s25 + $0x3c] sm:$0xf] %vm1749_vm2, %v2056_v53  ;;  %v1575_v61 = vadd.f32 %v2940_v21, %v1496_v54  ;;  %v1499_v62 = vadd.f32 %v2274_v60, %v2240_v59  ;;  %v1195_v63 = vpop.f32.mrb[19].mxu1  ;;  %v2277_v12 = vpop.f32.mrb[20].mxu0 }
 0x26f   : > { %1763 = vst.msk [vmem:[%s2767_s25 + $0x34] sm:$0xf] %vm1749_vm2, %v2054_v57  ;;  %v1573_v1 = vadd.f32 %v2940_v21, %v1488_v58  ;;  %v1491_v2 = vadd.f32 %v1490_v0, %v1195_v63  ;;  %v1503_v16 = vpop.f32.mrb[21].mxu0 }
 0x270   : > { %v1607_v3 = vmax.f32 %v1575_v61, 0.0  ;;  %v1576_v4 = vadd.f32 %v2940_v21, %v1499_v62  ;;  %v2278_v20 = vpop.f32.mrb[22].mxu0 }
 0x271   : > { %v1605_v5 = vmax.f32 %v1573_v1, 0.0  ;;  %v1574_v6 = vadd.f32 %v2940_v21, %v1491_v2  ;;  %v1506_v25 = vpop.f32.mrb[23].mxu0 }
 0x272   : > { %v2059_v7 = vpack.c.bf16 %v1607_v3, %v1607_v3  ;;  %v1608_v8 = vmax.f32 %v1576_v4, 0.0 }
 0x273   : > { %v2057_v9 = vpack.c.bf16 %v1605_v5, %v1605_v5  ;;  %v1606_v10 = vmax.f32 %v1574_v6, 0.0  ;;  %v2243_v11 = vpop.f32.mrb[20].mxu1 }
 0x274   : > { %1768 = vst.msk [vmem:[%s2767_s25 + $0x48] sm:$0xf] %vm1749_vm2, %v2059_v7  ;;  %v2060_v13 = vpack.c.bf16 %v1608_v8, %v1608_v8  ;;  %v1512_v14 = vadd.f32 %v2277_v12, %v2243_v11  ;;  %v1208_v15 = vpop.f32.mrb[21].mxu1 }
 0x275   : > { %1766 = vst.msk [vmem:[%s2767_s25 + $0x40] sm:$0xf] %vm1749_vm2, %v2057_v9  ;;  %v2058_v17 = vpack.c.bf16 %v1606_v10, %v1606_v10  ;;  %v1504_v18 = vadd.f32 %v1503_v16, %v1208_v15  ;;  %v2244_v19 = vpop.f32.mrb[22].mxu1 }
 0x276   : > { %1769 = vst.msk [vmem:[%s2767_s25 + $0x4c] sm:$0xf] %vm1749_vm2, %v2060_v13  ;;  %v1579_v22 = vadd.f32 %v2940_v21, %v1512_v14  ;;  %v1515_v23 = vadd.f32 %v2278_v20, %v2244_v19  ;;  %v1211_v24 = vpop.f32.mrb[23].mxu1  ;;  %v2281_v37 = vpop.f32.mrb[24].mxu0 }
 0x277   : > { %1767 = vst.msk [vmem:[%s2767_s25 + $0x44] sm:$0xf] %vm1749_vm2, %v2058_v17  ;;  %v1577_v26 = vadd.f32 %v2940_v21, %v1504_v18  ;;  %v1507_v27 = vadd.f32 %v1506_v25, %v1211_v24  ;;  %v1519_v41 = vpop.f32.mrb[25].mxu0 }
 0x278   : > { %v1611_v28 = vmax.f32 %v1579_v22, 0.0  ;;  %v1580_v29 = vadd.f32 %v2940_v21, %v1515_v23  ;;  %v2282_v45 = vpop.f32.mrb[26].mxu0 }
 0x279   : > { %v1609_v30 = vmax.f32 %v1577_v26, 0.0  ;;  %v1578_v31 = vadd.f32 %v2940_v21, %v1507_v27  ;;  %v1522_v49 = vpop.f32.mrb[27].mxu0 }
 0x27a   : > { %v2063_v32 = vpack.c.bf16 %v1611_v28, %v1611_v28  ;;  %v1612_v33 = vmax.f32 %v1580_v29, 0.0 }
 0x27b   : > { %v2061_v34 = vpack.c.bf16 %v1609_v30, %v1609_v30  ;;  %v1610_v35 = vmax.f32 %v1578_v31, 0.0  ;;  %v2247_v36 = vpop.f32.mrb[24].mxu1 }
 0x27c   : > { %1772 = vst.msk [vmem:[%s2767_s25 + $0x58] sm:$0xf] %vm1749_vm2, %v2063_v32  ;;  %v2064_v38 = vpack.c.bf16 %v1612_v33, %v1612_v33  ;;  %v1528_v39 = vadd.f32 %v2281_v37, %v2247_v36  ;;  %v1224_v40 = vpop.f32.mrb[25].mxu1 }
 0x27d   : > { %1770 = vst.msk [vmem:[%s2767_s25 + $0x50] sm:$0xf] %vm1749_vm2, %v2061_v34  ;;  %v2062_v42 = vpack.c.bf16 %v1610_v35, %v1610_v35  ;;  %v1520_v43 = vadd.f32 %v1519_v41, %v1224_v40  ;;  %v2248_v44 = vpop.f32.mrb[26].mxu1 }
 0x27e   : > { %1773 = vst.msk [vmem:[%s2767_s25 + $0x5c] sm:$0xf] %vm1749_vm2, %v2064_v38  ;;  %v1583_v46 = vadd.f32 %v2940_v21, %v1528_v39  ;;  %v1531_v47 = vadd.f32 %v2282_v45, %v2248_v44  ;;  %v1227_v48 = vpop.f32.mrb[27].mxu1  ;;  %v2285_v61 = vpop.f32.mrb[28].mxu0 }
 0x27f   : > { %1771 = vst.msk [vmem:[%s2767_s25 + $0x54] sm:$0xf] %vm1749_vm2, %v2062_v42  ;;  %v1581_v50 = vadd.f32 %v2940_v21, %v1520_v43  ;;  %v1523_v51 = vadd.f32 %v1522_v49, %v1227_v48  ;;  %v1535_v1 = vpop.f32.mrb[29].mxu0 }
 0x280   : > { %v1615_v52 = vmax.f32 %v1583_v46, 0.0  ;;  %v1584_v53 = vadd.f32 %v2940_v21, %v1531_v47  ;;  %v2286_v5 = vpop.f32.mrb[30].mxu0 }
 0x281   : > { %v1613_v54 = vmax.f32 %v1581_v50, 0.0  ;;  %v1582_v55 = vadd.f32 %v2940_v21, %v1523_v51  ;;  %v1538_v9 = vpop.f32.mrb[31].mxu0 }
 0x282   : > { %v2067_v56 = vpack.c.bf16 %v1615_v52, %v1615_v52  ;;  %v1616_v57 = vmax.f32 %v1584_v53, 0.0 }
 0x283   : > { %v2065_v58 = vpack.c.bf16 %v1613_v54, %v1613_v54  ;;  %v1614_v59 = vmax.f32 %v1582_v55, 0.0  ;;  %v2251_v60 = vpop.f32.mrb[28].mxu1 }
 0x284   : > { %1776 = vst.msk [vmem:[%s2767_s25 + $0x68] sm:$0xf] %vm1749_vm2, %v2067_v56  ;;  %v2068_v62 = vpack.c.bf16 %v1616_v57, %v1616_v57  ;;  %v1544_v63 = vadd.f32 %v2285_v61, %v2251_v60  ;;  %v1240_v0 = vpop.f32.mrb[29].mxu1 }
 0x285   : > { %1774 = vst.msk [vmem:[%s2767_s25 + $0x60] sm:$0xf] %vm1749_vm2, %v2065_v58  ;;  %v2066_v2 = vpack.c.bf16 %v1614_v59, %v1614_v59  ;;  %v1536_v3 = vadd.f32 %v1535_v1, %v1240_v0  ;;  %v2252_v4 = vpop.f32.mrb[30].mxu1 }
 0x286   : > { %1777 = vst.msk [vmem:[%s2767_s25 + $0x6c] sm:$0xf] %vm1749_vm2, %v2068_v62  ;;  %v1587_v6 = vadd.f32 %v2940_v21, %v1544_v63  ;;  %v1547_v7 = vadd.f32 %v2286_v5, %v2252_v4  ;;  %v1243_v8 = vpop.f32.mrb[31].mxu1 }
 0x287   : > { %1775 = vst.msk [vmem:[%s2767_s25 + $0x64] sm:$0xf] %vm1749_vm2, %v2066_v2  ;;  %v1585_v10 = vadd.f32 %v2940_v21, %v1536_v3  ;;  %v1539_v11 = vadd.f32 %v1538_v9, %v1243_v8 }
 0x288   : > { %v1619_v12 = vmax.f32 %v1587_v6, 0.0  ;;  %v1588_v13 = vadd.f32 %v2940_v21, %v1547_v7 }
 0x289   : > { %v1617_v14 = vmax.f32 %v1585_v10, 0.0  ;;  %v1586_v15 = vadd.f32 %v2940_v21, %v1539_v11 }
 0x28a   : > { %v2071_v16 = vpack.c.bf16 %v1619_v12, %v1619_v12  ;;  %v1620_v17 = vmax.f32 %v1588_v13, 0.0 }
 0x28b   : > { %v2069_v18 = vpack.c.bf16 %v1617_v14, %v1617_v14  ;;  %v1618_v19 = vmax.f32 %v1586_v15, 0.0 }
 0x28c   : > { %1780 = vst.msk [vmem:[%s2767_s25 + $0x78] sm:$0xf] %vm1749_vm2, %v2071_v16  ;;  %v2072_v20 = vpack.c.bf16 %v1620_v17, %v1620_v17 }
 0x28d   : > { %1778 = vst.msk [vmem:[%s2767_s25 + $0x70] sm:$0xf] %vm1749_vm2, %v2069_v18  ;;  %v2070_v22 = vpack.c.bf16 %v1618_v19, %v1618_v19 }
 0x28e   : > { %1781 = vst.msk [vmem:[%s2767_s25 + $0x7c] sm:$0xf] %vm1749_vm2, %v2072_v20 }
 0x28f   : > { %1779 = vst.msk [vmem:[%s2767_s25 + $0x74] sm:$0xf] %vm1749_vm2, %v2070_v22 }
 0x290 PF: > { %s19_s28 = sadd.s32 1, %s2588_s28   ;;  %s3078_s9 = sld [smem:[#allocation6_spill]] }
 0x291   : > { %p16_p8 = scmp.ge.s32.totalorder %s19_s28, 6   ;;  %s3079_s21 = smov %s2564_s22 }
 0x292   : > { %s3080_s22 = smov %s2568_s23  ;;  %s3081_s23 = smov %s2697_s17 }
 0x293   : > { %s3082_s24 = smov %s2580_s26  ;;  %s3083_s25 = smov %s2584_s27 }
 0x294   : > { %s3085_s27 = smov %s3091_s7  ;;  %18 = sbr.rel (!%p16_p8) target bundleno = 8 (0x8), region = 98 }
 0x296   : > { %s3084_s26 = smov %s3078_s9 }
 0x29b   :  { %1804 = vsyncpa [#allocation4], 1 }
 0x29c   :  { %1806 = vsyncpa [#allocation4 + $0x1], 1 }

</bundles_post_ra>
